<compile_context>
chip_gen: v7x
topology: tpu7x:2x2x1
jax: 0.10.0
libtpu: 0.0.40
codegen_flags: <defaults>
</compile_context>

<pallas_src>
import functools

import jax
import jax.numpy as jnp
from jax import lax
from jax.experimental import pallas as pl
from jax.experimental.pallas import tpu as pltpu


# ---------------------------------------------------------------------------
# Fused kernel (all LSTM layers + fc head)
# ---------------------------------------------------------------------------
def _make_fused_kernel(num_layers, T, B, H):
    """Builds kernel(x, (wih,whh,b)*L, fc_w, fc_b, out, gates_sc, seq_sc)."""

    def kernel(*refs):
        x_ref = refs[0]
        layer_refs = []
        idx = 1
        for _ in range(num_layers):
            layer_refs.append((refs[idx], refs[idx + 1], refs[idx + 2]))
            idx += 3
        fc_w_ref, fc_b_ref = refs[idx], refs[idx + 1]
        out_ref = refs[idx + 2]
        gates_sc = refs[idx + 3]   # (T, B, 4H) f32 : precomputed input projections
        seq_sc = refs[idx + 4]     # (T, B, H) bf16 : inter-layer activations

        def run_layer(layer_idx, in_seq_bf):
            """in_seq_bf: (T*B, Din) bf16 value. Returns final hidden state (B, H) f32."""
            wih_ref, whh_ref, b_ref = layer_refs[layer_idx]
            wih = wih_ref[...]      # (Din, 4H) bf16 -- hoisted out of the loop
            whh = whh_ref[...]      # (H,   4H) bf16 -- hoisted out of the loop
            bias = b_ref[...]       # (1,   4H) f32

            # Batched input projection for all timesteps at once (one big MXU op);
            # bias folded in here, so the recurrent loop only adds the H-projection.
            proj = jnp.dot(in_seq_bf, wih, preferred_element_type=jnp.float32) + bias
            gates_sc[...] = proj.reshape(T, B, 4 * H)

            is_last = layer_idx == num_layers - 1

            h = jnp.zeros((B, H), jnp.float32)
            c = jnp.zeros((B, H), jnp.float32)
            # T is static & small -> fully unrolled recurrence; h/c live in vregs.
            for t in range(T):
                g = gates_sc[t] + jnp.dot(
                    h.astype(jnp.bfloat16), whh, preferred_element_type=jnp.float32
                )  # (B, 4H) f32
                i_g = jax.nn.sigmoid(g[:, 0:H])
                f_g = jax.nn.sigmoid(g[:, H:2 * H])
                g_g = jnp.tanh(g[:, 2 * H:3 * H])
                o_g = jax.nn.sigmoid(g[:, 3 * H:4 * H])
                c = f_g * c + i_g * g_g
                h = o_g * jnp.tanh(c)
                if not is_last:
                    seq_sc[t] = h.astype(jnp.bfloat16)
            return h

        # Layer 0 consumes the raw input sequence.
        x_bf = x_ref[...].astype(jnp.bfloat16).reshape(T * B, -1)
        h_last = run_layer(0, x_bf)
        # Remaining layers consume the previous layer's VMEM-resident outputs.
        for layer in range(1, num_layers):
            in_bf = seq_sc[...].reshape(T * B, H)
            h_last = run_layer(layer, in_bf)

        # Fused fc head: (B, H) @ (H, 5) + (1, 5).
        out_ref[...] = (
            jnp.dot(h_last.astype(jnp.bfloat16), fc_w_ref[...],
                    preferred_element_type=jnp.float32)
            + fc_b_ref[...]
        )

    return kernel


# ---------------------------------------------------------------------------
# Wrapper
# ---------------------------------------------------------------------------
def _vmem_spec():
    return pl.BlockSpec(memory_space=pltpu.MemorySpace.VMEM)


@jax.jit
def lstm_submodel_forward(x, params):
    """x: (B, T, input_dim) batch-first, same as the PyTorch module. Returns (B, 5)."""
    B, T, _ = x.shape
    num_layers = len(params["lstm"])
    H = params["lstm"][0]["whh_t"].shape[0]
    out_dim = params["fc_w_t"].shape[1]

    # Time-major + batch padded to a sublane multiple (8) for aligned tiles.
    B_pad = max(8, ((B + 7) // 8) * 8)
    xt = jnp.transpose(x, (1, 0, 2))  # (T, B, D)
    if B_pad != B:
        xt = jnp.pad(xt, ((0, 0), (0, B_pad - B), (0, 0)))

    flat_inputs = [xt]
    for lp in params["lstm"]:
        flat_inputs += [lp["wih_t"], lp["whh_t"], lp["b"]]
    flat_inputs += [params["fc_w_t"], params["fc_b"]]

    kernel = _make_fused_kernel(num_layers, T, B_pad, H)
    out = pl.pallas_call(
        kernel,
        out_shape=jax.ShapeDtypeStruct((B_pad, out_dim), jnp.float32),
        in_specs=[_vmem_spec()] * len(flat_inputs),
        out_specs=_vmem_spec(),
        scratch_shapes=[
            pltpu.VMEM((T, B_pad, 4 * H), jnp.float32),   # precomputed gates
            pltpu.VMEM((T, B_pad, H), jnp.bfloat16),      # inter-layer activations
        ],
    )(*flat_inputs)
    return out[:B]

    # TODO(synk): inter-layer dropout (p=0.2) is train-mode only; eval semantics
    # (dropout disabled) are implemented here.


# ---------------------------------------------------------------------------
# Parameter init (deterministic, PyTorch-style U(-1/sqrt(H), 1/sqrt(H)))
# ---------------------------------------------------------------------------
def init_params(key, input_dim, hidden_dim, num_layers, out_dim=5):
    bound = 1.0 / jnp.sqrt(hidden_dim)
    params = {"lstm": []}
    for layer in range(num_layers):
        d_in = input_dim if layer == 0 else hidden_dim
        key, k1, k2, k3, k4 = jax.random.split(key, 5)
        w_ih = jax.random.uniform(k1, (4 * hidden_dim, d_in), jnp.float32, -bound, bound)
        w_hh = jax.random.uniform(k2, (4 * hidden_dim, hidden_dim), jnp.float32, -bound, bound)
        b_ih = jax.random.uniform(k3, (4 * hidden_dim,), jnp.float32, -bound, bound)
        b_hh = jax.random.uniform(k4, (4 * hidden_dim,), jnp.float32, -bound, bound)
        params["lstm"].append(
            {
                "wih_t": w_ih.T.astype(jnp.bfloat16),      # (d_in, 4H) MXU operand
                "whh_t": w_hh.T.astype(jnp.bfloat16),      # (H, 4H)    MXU operand
                "b": (b_ih + b_hh)[None, :],               # (1, 4H)    f32
            }
        )
    key, k5, k6 = jax.random.split(key, 3)
    fc_w = jax.random.uniform(k5, (out_dim, hidden_dim), jnp.float32, -bound, bound)
    fc_b = jax.random.uniform(k6, (out_dim,), jnp.float32, -bound, bound)
    params["fc_w_t"] = fc_w.T.astype(jnp.bfloat16)   # (H, 5)
    params["fc_b"] = fc_b[None, :]                    # (1, 5) f32
    return params


# ---------------------------------------------------------------------------
# Pure-JAX reference (mirrors the kernel's bf16-operand / f32-accumulate math)
# ---------------------------------------------------------------------------
def reference_forward(x, params):
    def mm(a, w_bf16):
        return jnp.dot(a.astype(jnp.bfloat16), w_bf16, preferred_element_type=jnp.float32)

    B = x.shape[0]
    seq = x  # (B, T, D)
    for lp in params["lstm"]:
        H = lp["whh_t"].shape[0]
        h = jnp.zeros((B, H), jnp.float32)
        c = jnp.zeros((B, H), jnp.float32)
        outs = []
        for t in range(seq.shape[1]):
            gates = mm(seq[:, t, :], lp["wih_t"]) + mm(h, lp["whh_t"]) + lp["b"]
            i = jax.nn.sigmoid(gates[:, 0:H])
            f = jax.nn.sigmoid(gates[:, H:2 * H])
            g = jnp.tanh(gates[:, 2 * H:3 * H])
            o = jax.nn.sigmoid(gates[:, 3 * H:4 * H])
            c = f * c + i * g
            h = o * jnp.tanh(c)
            outs.append(h)
        seq = jnp.stack(outs, axis=1)
    return mm(seq[:, -1, :], params["fc_w_t"]) + params["fc_b"]


# ---------------------------------------------------------------------------
# Main
# ---------------------------------------------------------------------------
if __name__ == "__main__":
    batch, seq_len = 2, 8
    input_dim, hidden_dim, num_layers = 16, 32, 2

    key = jax.random.PRNGKey(0)
    key, kx, kp = jax.random.split(key, 3)
    x = jax.random.normal(kx, (batch, seq_len, input_dim), jnp.float32)
    params = init_params(kp, input_dim, hidden_dim, num_layers)

    out = lstm_submodel_forward(x, params)
    out = jax.block_until_ready(out)
    assert out.shape == (batch, 5), out.shape

    ref = reference_forward(x, params)
    assert jnp.allclose(out, ref, atol=2e-3, rtol=2e-3), (out, ref)

    print("KERNEL_OK")
</pallas_src>

<mosaic_0001>
module attributes {stable_mosaic.version = 11 : i64} {
  func.func @kernel(%arg0: memref<8x8x16xf32, #tpu.memory_space<vmem>>, %arg1: memref<16x128xbf16, #tpu.memory_space<vmem>>, %arg2: memref<32x128xbf16, #tpu.memory_space<vmem>>, %arg3: memref<1x128xf32, #tpu.memory_space<vmem>>, %arg4: memref<32x128xbf16, #tpu.memory_space<vmem>>, %arg5: memref<32x128xbf16, #tpu.memory_space<vmem>>, %arg6: memref<1x128xf32, #tpu.memory_space<vmem>>, %arg7: memref<32x5xbf16, #tpu.memory_space<vmem>>, %arg8: memref<1x5xf32, #tpu.memory_space<vmem>>, %arg9: memref<8x5xf32, #tpu.memory_space<vmem>>, %arg10: memref<8x8x128xf32, #tpu.memory_space<vmem>>, %arg11: memref<8x8x32xbf16, #tpu.memory_space<vmem>>) attributes {dimension_semantics = [], scalar_prefetch = 0 : i64, scratch_operands = 2 : i64, tpu.core_type = #tpu.core_type<tc>} {
    %c0 = arith.constant 0 : index
    %c0_0 = arith.constant 0 : index
    %c0_1 = arith.constant 0 : index
    %0 = vector.load %arg0[%c0, %c0_0, %c0_1] : memref<8x8x16xf32, #tpu.memory_space<vmem>>, vector<8x8x16xf32>
    %1 = arith.truncf %0 : vector<8x8x16xf32> to vector<8x8x16xbf16>
    %2 = vector.shape_cast %1 : vector<8x8x16xbf16> to vector<64x16xbf16>
    %c0_2 = arith.constant 0 : index
    %c0_3 = arith.constant 0 : index
    %3 = vector.load %arg1[%c0_2, %c0_3] : memref<16x128xbf16, #tpu.memory_space<vmem>>, vector<16x128xbf16>
    %c0_4 = arith.constant 0 : index
    %c0_5 = arith.constant 0 : index
    %4 = vector.load %arg2[%c0_4, %c0_5] : memref<32x128xbf16, #tpu.memory_space<vmem>>, vector<32x128xbf16>
    %c0_6 = arith.constant 0 : index
    %c0_7 = arith.constant 0 : index
    %5 = vector.load %arg3[%c0_6, %c0_7] : memref<1x128xf32, #tpu.memory_space<vmem>>, vector<1x128xf32>
    %cst = arith.constant dense<0.000000e+00> : vector<64x128xf32>
    %6 = tpu.matmul %2, %3, %cst {dimension_numbers = #tpu.dot_dimension_numbers<[1], [0], [0], [1], [0, 0, 1, 1], [], []>} : vector<64x16xbf16>, vector<16x128xbf16>, vector<64x128xf32> -> vector<64x128xf32>
    %7 = vector.broadcast %5 : vector<1x128xf32> to vector<64x128xf32>
    %8 = arith.addf %6, %7 : vector<64x128xf32>
    %9 = vector.shape_cast %8 : vector<64x128xf32> to vector<8x8x128xf32>
    %c0_8 = arith.constant 0 : index
    %c0_9 = arith.constant 0 : index
    %c0_10 = arith.constant 0 : index
    %10 = vector.load %arg10[%c0_8, %c0_9, %c0_10] : memref<8x8x128xf32, #tpu.memory_space<vmem>>, vector<8x8x128xf32>
    tpu.vector_store %arg10[%c0_8, %c0_9, %c0_10], %9 {strides = array<i32>} : memref<8x8x128xf32, #tpu.memory_space<vmem>>, vector<8x8x128xf32>,
    %cst_11 = arith.constant 0.000000e+00 : f32
    %11 = vector.broadcast %cst_11 : f32 to vector<8x32xf32>
    %cst_12 = arith.constant 0.000000e+00 : f32
    %12 = vector.broadcast %cst_12 : f32 to vector<8x32xf32>
    %c0_13 = arith.constant 0 : index
    %c0_14 = arith.constant 0 : index
    %c0_15 = arith.constant 0 : index
    %13 = vector.load %arg10[%c0_13, %c0_14, %c0_15] : memref<8x8x128xf32, #tpu.memory_space<vmem>>, vector<1x8x128xf32>
    %14 = vector.shape_cast %13 : vector<1x8x128xf32> to vector<8x128xf32>
    %15 = arith.truncf %11 : vector<8x32xf32> to vector<8x32xbf16>
    %cst_16 = arith.constant dense<0.000000e+00> : vector<8x128xf32>
    %16 = tpu.matmul %15, %4, %cst_16 {dimension_numbers = #tpu.dot_dimension_numbers<[1], [0], [0], [1], [0, 0, 1, 1], [], []>} : vector<8x32xbf16>, vector<32x128xbf16>, vector<8x128xf32> -> vector<8x128xf32>
    %17 = arith.addf %14, %16 : vector<8x128xf32>
    %18 = vector.extract_strided_slice %17 {offsets = [0, 0], sizes = [8, 32], strides = [1, 1]} : vector<8x128xf32> to vector<8x32xf32>
    %19 = arith.negf %18 : vector<8x32xf32>
    %20 = math.exp %19 : vector<8x32xf32>
    %cst_17 = arith.constant 1.000000e+00 : f32
    %21 = vector.broadcast %cst_17 : f32 to vector<8x32xf32>
    %22 = arith.addf %21, %20 : vector<8x32xf32>
    %23 = arith.divf %21, %22 : vector<8x32xf32>
    %24 = vector.extract_strided_slice %17 {offsets = [0, 32], sizes = [8, 32], strides = [1, 1]} : vector<8x128xf32> to vector<8x32xf32>
    %25 = arith.negf %24 : vector<8x32xf32>
    %26 = math.exp %25 : vector<8x32xf32>
    %cst_18 = arith.constant 1.000000e+00 : f32
    %27 = vector.broadcast %cst_18 : f32 to vector<8x32xf32>
    %28 = arith.addf %27, %26 : vector<8x32xf32>
    %29 = arith.divf %27, %28 : vector<8x32xf32>
    %30 = vector.extract_strided_slice %17 {offsets = [0, 64], sizes = [8, 32], strides = [1, 1]} : vector<8x128xf32> to vector<8x32xf32>
    %31 = math.tanh %30 : vector<8x32xf32>
    %32 = vector.extract_strided_slice %17 {offsets = [0, 96], sizes = [8, 32], strides = [1, 1]} : vector<8x128xf32> to vector<8x32xf32>
    %33 = arith.negf %32 : vector<8x32xf32>
    %34 = math.exp %33 : vector<8x32xf32>
    %cst_19 = arith.constant 1.000000e+00 : f32
    %35 = vector.broadcast %cst_19 : f32 to vector<8x32xf32>
    %36 = arith.addf %35, %34 : vector<8x32xf32>
    %37 = arith.divf %35, %36 : vector<8x32xf32>
    %38 = arith.mulf %29, %12 : vector<8x32xf32>
    %39 = arith.mulf %23, %31 : vector<8x32xf32>
    %40 = arith.addf %38, %39 : vector<8x32xf32>
    %41 = math.tanh %40 : vector<8x32xf32>
    %42 = arith.mulf %37, %41 : vector<8x32xf32>
    %43 = arith.truncf %42 : vector<8x32xf32> to vector<8x32xbf16>
    %c0_20 = arith.constant 0 : index
    %c0_21 = arith.constant 0 : index
    %c0_22 = arith.constant 0 : index
    %44 = vector.load %arg11[%c0_20, %c0_21, %c0_22] : memref<8x8x32xbf16, #tpu.memory_space<vmem>>, vector<1x8x32xbf16>
    %45 = vector.shape_cast %44 : vector<1x8x32xbf16> to vector<8x32xbf16>
    %46 = vector.shape_cast %43 : vector<8x32xbf16> to vector<1x8x32xbf16>
    tpu.vector_store %arg11[%c0_20, %c0_21, %c0_22], %46 {strides = array<i32>} : memref<8x8x32xbf16, #tpu.memory_space<vmem>>, vector<1x8x32xbf16>,
    %c1 = arith.constant 1 : index
    %c0_23 = arith.constant 0 : index
    %c0_24 = arith.constant 0 : index
    %47 = vector.load %arg10[%c1, %c0_23, %c0_24] : memref<8x8x128xf32, #tpu.memory_space<vmem>>, vector<1x8x128xf32>
    %48 = vector.shape_cast %47 : vector<1x8x128xf32> to vector<8x128xf32>
    %49 = arith.truncf %42 : vector<8x32xf32> to vector<8x32xbf16>
    %cst_25 = arith.constant dense<0.000000e+00> : vector<8x128xf32>
    %50 = tpu.matmul %49, %4, %cst_25 {dimension_numbers = #tpu.dot_dimension_numbers<[1], [0], [0], [1], [0, 0, 1, 1], [], []>} : vector<8x32xbf16>, vector<32x128xbf16>, vector<8x128xf32> -> vector<8x128xf32>
    %51 = arith.addf %48, %50 : vector<8x128xf32>
    %52 = vector.extract_strided_slice %51 {offsets = [0, 0], sizes = [8, 32], strides = [1, 1]} : vector<8x128xf32> to vector<8x32xf32>
    %53 = arith.negf %52 : vector<8x32xf32>
    %54 = math.exp %53 : vector<8x32xf32>
    %cst_26 = arith.constant 1.000000e+00 : f32
    %55 = vector.broadcast %cst_26 : f32 to vector<8x32xf32>
    %56 = arith.addf %55, %54 : vector<8x32xf32>
    %57 = arith.divf %55, %56 : vector<8x32xf32>
    %58 = vector.extract_strided_slice %51 {offsets = [0, 32], sizes = [8, 32], strides = [1, 1]} : vector<8x128xf32> to vector<8x32xf32>
    %59 = arith.negf %58 : vector<8x32xf32>
    %60 = math.exp %59 : vector<8x32xf32>
    %cst_27 = arith.constant 1.000000e+00 : f32
    %61 = vector.broadcast %cst_27 : f32 to vector<8x32xf32>
    %62 = arith.addf %61, %60 : vector<8x32xf32>
    %63 = arith.divf %61, %62 : vector<8x32xf32>
    %64 = vector.extract_strided_slice %51 {offsets = [0, 64], sizes = [8, 32], strides = [1, 1]} : vector<8x128xf32> to vector<8x32xf32>
    %65 = math.tanh %64 : vector<8x32xf32>
    %66 = vector.extract_strided_slice %51 {offsets = [0, 96], sizes = [8, 32], strides = [1, 1]} : vector<8x128xf32> to vector<8x32xf32>
    %67 = arith.negf %66 : vector<8x32xf32>
    %68 = math.exp %67 : vector<8x32xf32>
    %cst_28 = arith.constant 1.000000e+00 : f32
    %69 = vector.broadcast %cst_28 : f32 to vector<8x32xf32>
    %70 = arith.addf %69, %68 : vector<8x32xf32>
    %71 = arith.divf %69, %70 : vector<8x32xf32>
    %72 = arith.mulf %63, %40 : vector<8x32xf32>
    %73 = arith.mulf %57, %65 : vector<8x32xf32>
    %74 = arith.addf %72, %73 : vector<8x32xf32>
    %75 = math.tanh %74 : vector<8x32xf32>
    %76 = arith.mulf %71, %75 : vector<8x32xf32>
    %77 = arith.truncf %76 : vector<8x32xf32> to vector<8x32xbf16>
    %c1_29 = arith.constant 1 : index
    %c0_30 = arith.constant 0 : index
    %c0_31 = arith.constant 0 : index
    %78 = vector.load %arg11[%c1_29, %c0_30, %c0_31] : memref<8x8x32xbf16, #tpu.memory_space<vmem>>, vector<1x8x32xbf16>
    %79 = vector.shape_cast %78 : vector<1x8x32xbf16> to vector<8x32xbf16>
    %80 = vector.shape_cast %77 : vector<8x32xbf16> to vector<1x8x32xbf16>
    tpu.vector_store %arg11[%c1_29, %c0_30, %c0_31], %80 {strides = array<i32>} : memref<8x8x32xbf16, #tpu.memory_space<vmem>>, vector<1x8x32xbf16>,
    %c2 = arith.constant 2 : index
    %c0_32 = arith.constant 0 : index
    %c0_33 = arith.constant 0 : index
    %81 = vector.load %arg10[%c2, %c0_32, %c0_33] : memref<8x8x128xf32, #tpu.memory_space<vmem>>, vector<1x8x128xf32>
    %82 = vector.shape_cast %81 : vector<1x8x128xf32> to vector<8x128xf32>
    %83 = arith.truncf %76 : vector<8x32xf32> to vector<8x32xbf16>
    %cst_34 = arith.constant dense<0.000000e+00> : vector<8x128xf32>
    %84 = tpu.matmul %83, %4, %cst_34 {dimension_numbers = #tpu.dot_dimension_numbers<[1], [0], [0], [1], [0, 0, 1, 1], [], []>} : vector<8x32xbf16>, vector<32x128xbf16>, vector<8x128xf32> -> vector<8x128xf32>
    %85 = arith.addf %82, %84 : vector<8x128xf32>
    %86 = vector.extract_strided_slice %85 {offsets = [0, 0], sizes = [8, 32], strides = [1, 1]} : vector<8x128xf32> to vector<8x32xf32>
    %87 = arith.negf %86 : vector<8x32xf32>
    %88 = math.exp %87 : vector<8x32xf32>
    %cst_35 = arith.constant 1.000000e+00 : f32
    %89 = vector.broadcast %cst_35 : f32 to vector<8x32xf32>
    %90 = arith.addf %89, %88 : vector<8x32xf32>
    %91 = arith.divf %89, %90 : vector<8x32xf32>
    %92 = vector.extract_strided_slice %85 {offsets = [0, 32], sizes = [8, 32], strides = [1, 1]} : vector<8x128xf32> to vector<8x32xf32>
    %93 = arith.negf %92 : vector<8x32xf32>
    %94 = math.exp %93 : vector<8x32xf32>
    %cst_36 = arith.constant 1.000000e+00 : f32
    %95 = vector.broadcast %cst_36 : f32 to vector<8x32xf32>
    %96 = arith.addf %95, %94 : vector<8x32xf32>
    %97 = arith.divf %95, %96 : vector<8x32xf32>
    %98 = vector.extract_strided_slice %85 {offsets = [0, 64], sizes = [8, 32], strides = [1, 1]} : vector<8x128xf32> to vector<8x32xf32>
    %99 = math.tanh %98 : vector<8x32xf32>
    %100 = vector.extract_strided_slice %85 {offsets = [0, 96], sizes = [8, 32], strides = [1, 1]} : vector<8x128xf32> to vector<8x32xf32>
    %101 = arith.negf %100 : vector<8x32xf32>
    %102 = math.exp %101 : vector<8x32xf32>
    %cst_37 = arith.constant 1.000000e+00 : f32
    %103 = vector.broadcast %cst_37 : f32 to vector<8x32xf32>
    %104 = arith.addf %103, %102 : vector<8x32xf32>
    %105 = arith.divf %103, %104 : vector<8x32xf32>
    %106 = arith.mulf %97, %74 : vector<8x32xf32>
    %107 = arith.mulf %91, %99 : vector<8x32xf32>
    %108 = arith.addf %106, %107 : vector<8x32xf32>
    %109 = math.tanh %108 : vector<8x32xf32>
    %110 = arith.mulf %105, %109 : vector<8x32xf32>
    %111 = arith.truncf %110 : vector<8x32xf32> to vector<8x32xbf16>
    %c2_38 = arith.constant 2 : index
    %c0_39 = arith.constant 0 : index
    %c0_40 = arith.constant 0 : index
    %112 = vector.load %arg11[%c2_38, %c0_39, %c0_40] : memref<8x8x32xbf16, #tpu.memory_space<vmem>>, vector<1x8x32xbf16>
    %113 = vector.shape_cast %112 : vector<1x8x32xbf16> to vector<8x32xbf16>
    %114 = vector.shape_cast %111 : vector<8x32xbf16> to vector<1x8x32xbf16>
    tpu.vector_store %arg11[%c2_38, %c0_39, %c0_40], %114 {strides = array<i32>} : memref<8x8x32xbf16, #tpu.memory_space<vmem>>, vector<1x8x32xbf16>,
    %c3 = arith.constant 3 : index
    %c0_41 = arith.constant 0 : index
    %c0_42 = arith.constant 0 : index
    %115 = vector.load %arg10[%c3, %c0_41, %c0_42] : memref<8x8x128xf32, #tpu.memory_space<vmem>>, vector<1x8x128xf32>
    %116 = vector.shape_cast %115 : vector<1x8x128xf32> to vector<8x128xf32>
    %117 = arith.truncf %110 : vector<8x32xf32> to vector<8x32xbf16>
    %cst_43 = arith.constant dense<0.000000e+00> : vector<8x128xf32>
    %118 = tpu.matmul %117, %4, %cst_43 {dimension_numbers = #tpu.dot_dimension_numbers<[1], [0], [0], [1], [0, 0, 1, 1], [], []>} : vector<8x32xbf16>, vector<32x128xbf16>, vector<8x128xf32> -> vector<8x128xf32>
    %119 = arith.addf %116, %118 : vector<8x128xf32>
    %120 = vector.extract_strided_slice %119 {offsets = [0, 0], sizes = [8, 32], strides = [1, 1]} : vector<8x128xf32> to vector<8x32xf32>
    %121 = arith.negf %120 : vector<8x32xf32>
    %122 = math.exp %121 : vector<8x32xf32>
    %cst_44 = arith.constant 1.000000e+00 : f32
    %123 = vector.broadcast %cst_44 : f32 to vector<8x32xf32>
    %124 = arith.addf %123, %122 : vector<8x32xf32>
    %125 = arith.divf %123, %124 : vector<8x32xf32>
    %126 = vector.extract_strided_slice %119 {offsets = [0, 32], sizes = [8, 32], strides = [1, 1]} : vector<8x128xf32> to vector<8x32xf32>
    %127 = arith.negf %126 : vector<8x32xf32>
    %128 = math.exp %127 : vector<8x32xf32>
    %cst_45 = arith.constant 1.000000e+00 : f32
    %129 = vector.broadcast %cst_45 : f32 to vector<8x32xf32>
    %130 = arith.addf %129, %128 : vector<8x32xf32>
    %131 = arith.divf %129, %130 : vector<8x32xf32>
    %132 = vector.extract_strided_slice %119 {offsets = [0, 64], sizes = [8, 32], strides = [1, 1]} : vector<8x128xf32> to vector<8x32xf32>
    %133 = math.tanh %132 : vector<8x32xf32>
    %134 = vector.extract_strided_slice %119 {offsets = [0, 96], sizes = [8, 32], strides = [1, 1]} : vector<8x128xf32> to vector<8x32xf32>
    %135 = arith.negf %134 : vector<8x32xf32>
    %136 = math.exp %135 : vector<8x32xf32>
    %cst_46 = arith.constant 1.000000e+00 : f32
    %137 = vector.broadcast %cst_46 : f32 to vector<8x32xf32>
    %138 = arith.addf %137, %136 : vector<8x32xf32>
    %139 = arith.divf %137, %138 : vector<8x32xf32>
    %140 = arith.mulf %131, %108 : vector<8x32xf32>
    %141 = arith.mulf %125, %133 : vector<8x32xf32>
    %142 = arith.addf %140, %141 : vector<8x32xf32>
    %143 = math.tanh %142 : vector<8x32xf32>
    %144 = arith.mulf %139, %143 : vector<8x32xf32>
    %145 = arith.truncf %144 : vector<8x32xf32> to vector<8x32xbf16>
    %c3_47 = arith.constant 3 : index
    %c0_48 = arith.constant 0 : index
    %c0_49 = arith.constant 0 : index
    %146 = vector.load %arg11[%c3_47, %c0_48, %c0_49] : memref<8x8x32xbf16, #tpu.memory_space<vmem>>, vector<1x8x32xbf16>
    %147 = vector.shape_cast %146 : vector<1x8x32xbf16> to vector<8x32xbf16>
    %148 = vector.shape_cast %145 : vector<8x32xbf16> to vector<1x8x32xbf16>
    tpu.vector_store %arg11[%c3_47, %c0_48, %c0_49], %148 {strides = array<i32>} : memref<8x8x32xbf16, #tpu.memory_space<vmem>>, vector<1x8x32xbf16>,
    %c4 = arith.constant 4 : index
    %c0_50 = arith.constant 0 : index
    %c0_51 = arith.constant 0 : index
    %149 = vector.load %arg10[%c4, %c0_50, %c0_51] : memref<8x8x128xf32, #tpu.memory_space<vmem>>, vector<1x8x128xf32>
    %150 = vector.shape_cast %149 : vector<1x8x128xf32> to vector<8x128xf32>
    %151 = arith.truncf %144 : vector<8x32xf32> to vector<8x32xbf16>
    %cst_52 = arith.constant dense<0.000000e+00> : vector<8x128xf32>
    %152 = tpu.matmul %151, %4, %cst_52 {dimension_numbers = #tpu.dot_dimension_numbers<[1], [0], [0], [1], [0, 0, 1, 1], [], []>} : vector<8x32xbf16>, vector<32x128xbf16>, vector<8x128xf32> -> vector<8x128xf32>
    %153 = arith.addf %150, %152 : vector<8x128xf32>
    %154 = vector.extract_strided_slice %153 {offsets = [0, 0], sizes = [8, 32], strides = [1, 1]} : vector<8x128xf32> to vector<8x32xf32>
    %155 = arith.negf %154 : vector<8x32xf32>
    %156 = math.exp %155 : vector<8x32xf32>
    %cst_53 = arith.constant 1.000000e+00 : f32
    %157 = vector.broadcast %cst_53 : f32 to vector<8x32xf32>
    %158 = arith.addf %157, %156 : vector<8x32xf32>
    %159 = arith.divf %157, %158 : vector<8x32xf32>
    %160 = vector.extract_strided_slice %153 {offsets = [0, 32], sizes = [8, 32], strides = [1, 1]} : vector<8x128xf32> to vector<8x32xf32>
    %161 = arith.negf %160 : vector<8x32xf32>
    %162 = math.exp %161 : vector<8x32xf32>
    %cst_54 = arith.constant 1.000000e+00 : f32
    %163 = vector.broadcast %cst_54 : f32 to vector<8x32xf32>
    %164 = arith.addf %163, %162 : vector<8x32xf32>
    %165 = arith.divf %163, %164 : vector<8x32xf32>
    %166 = vector.extract_strided_slice %153 {offsets = [0, 64], sizes = [8, 32], strides = [1, 1]} : vector<8x128xf32> to vector<8x32xf32>
    %167 = math.tanh %166 : vector<8x32xf32>
    %168 = vector.extract_strided_slice %153 {offsets = [0, 96], sizes = [8, 32], strides = [1, 1]} : vector<8x128xf32> to vector<8x32xf32>
    %169 = arith.negf %168 : vector<8x32xf32>
    %170 = math.exp %169 : vector<8x32xf32>
    %cst_55 = arith.constant 1.000000e+00 : f32
    %171 = vector.broadcast %cst_55 : f32 to vector<8x32xf32>
    %172 = arith.addf %171, %170 : vector<8x32xf32>
    %173 = arith.divf %171, %172 : vector<8x32xf32>
    %174 = arith.mulf %165, %142 : vector<8x32xf32>
    %175 = arith.mulf %159, %167 : vector<8x32xf32>
    %176 = arith.addf %174, %175 : vector<8x32xf32>
    %177 = math.tanh %176 : vector<8x32xf32>
    %178 = arith.mulf %173, %177 : vector<8x32xf32>
    %179 = arith.truncf %178 : vector<8x32xf32> to vector<8x32xbf16>
    %c4_56 = arith.constant 4 : index
    %c0_57 = arith.constant 0 : index
    %c0_58 = arith.constant 0 : index
    %180 = vector.load %arg11[%c4_56, %c0_57, %c0_58] : memref<8x8x32xbf16, #tpu.memory_space<vmem>>, vector<1x8x32xbf16>
    %181 = vector.shape_cast %180 : vector<1x8x32xbf16> to vector<8x32xbf16>
    %182 = vector.shape_cast %179 : vector<8x32xbf16> to vector<1x8x32xbf16>
    tpu.vector_store %arg11[%c4_56, %c0_57, %c0_58], %182 {strides = array<i32>} : memref<8x8x32xbf16, #tpu.memory_space<vmem>>, vector<1x8x32xbf16>,
    %c5 = arith.constant 5 : index
    %c0_59 = arith.constant 0 : index
    %c0_60 = arith.constant 0 : index
    %183 = vector.load %arg10[%c5, %c0_59, %c0_60] : memref<8x8x128xf32, #tpu.memory_space<vmem>>, vector<1x8x128xf32>
    %184 = vector.shape_cast %183 : vector<1x8x128xf32> to vector<8x128xf32>
    %185 = arith.truncf %178 : vector<8x32xf32> to vector<8x32xbf16>
    %cst_61 = arith.constant dense<0.000000e+00> : vector<8x128xf32>
    %186 = tpu.matmul %185, %4, %cst_61 {dimension_numbers = #tpu.dot_dimension_numbers<[1], [0], [0], [1], [0, 0, 1, 1], [], []>} : vector<8x32xbf16>, vector<32x128xbf16>, vector<8x128xf32> -> vector<8x128xf32>
    %187 = arith.addf %184, %186 : vector<8x128xf32>
    %188 = vector.extract_strided_slice %187 {offsets = [0, 0], sizes = [8, 32], strides = [1, 1]} : vector<8x128xf32> to vector<8x32xf32>
    %189 = arith.negf %188 : vector<8x32xf32>
    %190 = math.exp %189 : vector<8x32xf32>
    %cst_62 = arith.constant 1.000000e+00 : f32
    %191 = vector.broadcast %cst_62 : f32 to vector<8x32xf32>
    %192 = arith.addf %191, %190 : vector<8x32xf32>
    %193 = arith.divf %191, %192 : vector<8x32xf32>
    %194 = vector.extract_strided_slice %187 {offsets = [0, 32], sizes = [8, 32], strides = [1, 1]} : vector<8x128xf32> to vector<8x32xf32>
    %195 = arith.negf %194 : vector<8x32xf32>
    %196 = math.exp %195 : vector<8x32xf32>
    %cst_63 = arith.constant 1.000000e+00 : f32
    %197 = vector.broadcast %cst_63 : f32 to vector<8x32xf32>
    %198 = arith.addf %197, %196 : vector<8x32xf32>
    %199 = arith.divf %197, %198 : vector<8x32xf32>
    %200 = vector.extract_strided_slice %187 {offsets = [0, 64], sizes = [8, 32], strides = [1, 1]} : vector<8x128xf32> to vector<8x32xf32>
    %201 = math.tanh %200 : vector<8x32xf32>
    %202 = vector.extract_strided_slice %187 {offsets = [0, 96], sizes = [8, 32], strides = [1, 1]} : vector<8x128xf32> to vector<8x32xf32>
    %203 = arith.negf %202 : vector<8x32xf32>
    %204 = math.exp %203 : vector<8x32xf32>
    %cst_64 = arith.constant 1.000000e+00 : f32
    %205 = vector.broadcast %cst_64 : f32 to vector<8x32xf32>
    %206 = arith.addf %205, %204 : vector<8x32xf32>
    %207 = arith.divf %205, %206 : vector<8x32xf32>
    %208 = arith.mulf %199, %176 : vector<8x32xf32>
    %209 = arith.mulf %193, %201 : vector<8x32xf32>
    %210 = arith.addf %208, %209 : vector<8x32xf32>
    %211 = math.tanh %210 : vector<8x32xf32>
    %212 = arith.mulf %207, %211 : vector<8x32xf32>
    %213 = arith.truncf %212 : vector<8x32xf32> to vector<8x32xbf16>
    %c5_65 = arith.constant 5 : index
    %c0_66 = arith.constant 0 : index
    %c0_67 = arith.constant 0 : index
    %214 = vector.load %arg11[%c5_65, %c0_66, %c0_67] : memref<8x8x32xbf16, #tpu.memory_space<vmem>>, vector<1x8x32xbf16>
    %215 = vector.shape_cast %214 : vector<1x8x32xbf16> to vector<8x32xbf16>
    %216 = vector.shape_cast %213 : vector<8x32xbf16> to vector<1x8x32xbf16>
    tpu.vector_store %arg11[%c5_65, %c0_66, %c0_67], %216 {strides = array<i32>} : memref<8x8x32xbf16, #tpu.memory_space<vmem>>, vector<1x8x32xbf16>,
    %c6 = arith.constant 6 : index
    %c0_68 = arith.constant 0 : index
    %c0_69 = arith.constant 0 : index
    %217 = vector.load %arg10[%c6, %c0_68, %c0_69] : memref<8x8x128xf32, #tpu.memory_space<vmem>>, vector<1x8x128xf32>
    %218 = vector.shape_cast %217 : vector<1x8x128xf32> to vector<8x128xf32>
    %219 = arith.truncf %212 : vector<8x32xf32> to vector<8x32xbf16>
    %cst_70 = arith.constant dense<0.000000e+00> : vector<8x128xf32>
    %220 = tpu.matmul %219, %4, %cst_70 {dimension_numbers = #tpu.dot_dimension_numbers<[1], [0], [0], [1], [0, 0, 1, 1], [], []>} : vector<8x32xbf16>, vector<32x128xbf16>, vector<8x128xf32> -> vector<8x128xf32>
    %221 = arith.addf %218, %220 : vector<8x128xf32>
    %222 = vector.extract_strided_slice %221 {offsets = [0, 0], sizes = [8, 32], strides = [1, 1]} : vector<8x128xf32> to vector<8x32xf32>
    %223 = arith.negf %222 : vector<8x32xf32>
    %224 = math.exp %223 : vector<8x32xf32>
    %cst_71 = arith.constant 1.000000e+00 : f32
    %225 = vector.broadcast %cst_71 : f32 to vector<8x32xf32>
    %226 = arith.addf %225, %224 : vector<8x32xf32>
    %227 = arith.divf %225, %226 : vector<8x32xf32>
    %228 = vector.extract_strided_slice %221 {offsets = [0, 32], sizes = [8, 32], strides = [1, 1]} : vector<8x128xf32> to vector<8x32xf32>
    %229 = arith.negf %228 : vector<8x32xf32>
    %230 = math.exp %229 : vector<8x32xf32>
    %cst_72 = arith.constant 1.000000e+00 : f32
    %231 = vector.broadcast %cst_72 : f32 to vector<8x32xf32>
    %232 = arith.addf %231, %230 : vector<8x32xf32>
    %233 = arith.divf %231, %232 : vector<8x32xf32>
    %234 = vector.extract_strided_slice %221 {offsets = [0, 64], sizes = [8, 32], strides = [1, 1]} : vector<8x128xf32> to vector<8x32xf32>
    %235 = math.tanh %234 : vector<8x32xf32>
    %236 = vector.extract_strided_slice %221 {offsets = [0, 96], sizes = [8, 32], strides = [1, 1]} : vector<8x128xf32> to vector<8x32xf32>
    %237 = arith.negf %236 : vector<8x32xf32>
    %238 = math.exp %237 : vector<8x32xf32>
    %cst_73 = arith.constant 1.000000e+00 : f32
    %239 = vector.broadcast %cst_73 : f32 to vector<8x32xf32>
    %240 = arith.addf %239, %238 : vector<8x32xf32>
    %241 = arith.divf %239, %240 : vector<8x32xf32>
    %242 = arith.mulf %233, %210 : vector<8x32xf32>
    %243 = arith.mulf %227, %235 : vector<8x32xf32>
    %244 = arith.addf %242, %243 : vector<8x32xf32>
    %245 = math.tanh %244 : vector<8x32xf32>
    %246 = arith.mulf %241, %245 : vector<8x32xf32>
    %247 = arith.truncf %246 : vector<8x32xf32> to vector<8x32xbf16>
    %c6_74 = arith.constant 6 : index
    %c0_75 = arith.constant 0 : index
    %c0_76 = arith.constant 0 : index
    %248 = vector.load %arg11[%c6_74, %c0_75, %c0_76] : memref<8x8x32xbf16, #tpu.memory_space<vmem>>, vector<1x8x32xbf16>
    %249 = vector.shape_cast %248 : vector<1x8x32xbf16> to vector<8x32xbf16>
    %250 = vector.shape_cast %247 : vector<8x32xbf16> to vector<1x8x32xbf16>
    tpu.vector_store %arg11[%c6_74, %c0_75, %c0_76], %250 {strides = array<i32>} : memref<8x8x32xbf16, #tpu.memory_space<vmem>>, vector<1x8x32xbf16>,
    %c7 = arith.constant 7 : index
    %c0_77 = arith.constant 0 : index
    %c0_78 = arith.constant 0 : index
    %251 = vector.load %arg10[%c7, %c0_77, %c0_78] : memref<8x8x128xf32, #tpu.memory_space<vmem>>, vector<1x8x128xf32>
    %252 = vector.shape_cast %251 : vector<1x8x128xf32> to vector<8x128xf32>
    %253 = arith.truncf %246 : vector<8x32xf32> to vector<8x32xbf16>
    %cst_79 = arith.constant dense<0.000000e+00> : vector<8x128xf32>
    %254 = tpu.matmul %253, %4, %cst_79 {dimension_numbers = #tpu.dot_dimension_numbers<[1], [0], [0], [1], [0, 0, 1, 1], [], []>} : vector<8x32xbf16>, vector<32x128xbf16>, vector<8x128xf32> -> vector<8x128xf32>
    %255 = arith.addf %252, %254 : vector<8x128xf32>
    %256 = vector.extract_strided_slice %255 {offsets = [0, 0], sizes = [8, 32], strides = [1, 1]} : vector<8x128xf32> to vector<8x32xf32>
    %257 = arith.negf %256 : vector<8x32xf32>
    %258 = math.exp %257 : vector<8x32xf32>
    %cst_80 = arith.constant 1.000000e+00 : f32
    %259 = vector.broadcast %cst_80 : f32 to vector<8x32xf32>
    %260 = arith.addf %259, %258 : vector<8x32xf32>
    %261 = arith.divf %259, %260 : vector<8x32xf32>
    %262 = vector.extract_strided_slice %255 {offsets = [0, 32], sizes = [8, 32], strides = [1, 1]} : vector<8x128xf32> to vector<8x32xf32>
    %263 = arith.negf %262 : vector<8x32xf32>
    %264 = math.exp %263 : vector<8x32xf32>
    %cst_81 = arith.constant 1.000000e+00 : f32
    %265 = vector.broadcast %cst_81 : f32 to vector<8x32xf32>
    %266 = arith.addf %265, %264 : vector<8x32xf32>
    %267 = arith.divf %265, %266 : vector<8x32xf32>
    %268 = vector.extract_strided_slice %255 {offsets = [0, 64], sizes = [8, 32], strides = [1, 1]} : vector<8x128xf32> to vector<8x32xf32>
    %269 = math.tanh %268 : vector<8x32xf32>
    %270 = vector.extract_strided_slice %255 {offsets = [0, 96], sizes = [8, 32], strides = [1, 1]} : vector<8x128xf32> to vector<8x32xf32>
    %271 = arith.negf %270 : vector<8x32xf32>
    %272 = math.exp %271 : vector<8x32xf32>
    %cst_82 = arith.constant 1.000000e+00 : f32
    %273 = vector.broadcast %cst_82 : f32 to vector<8x32xf32>
    %274 = arith.addf %273, %272 : vector<8x32xf32>
    %275 = arith.divf %273, %274 : vector<8x32xf32>
    %276 = arith.mulf %267, %244 : vector<8x32xf32>
    %277 = arith.mulf %261, %269 : vector<8x32xf32>
    %278 = arith.addf %276, %277 : vector<8x32xf32>
    %279 = math.tanh %278 : vector<8x32xf32>
    %280 = arith.mulf %275, %279 : vector<8x32xf32>
    %281 = arith.truncf %280 : vector<8x32xf32> to vector<8x32xbf16>
    %c7_83 = arith.constant 7 : index
    %c0_84 = arith.constant 0 : index
    %c0_85 = arith.constant 0 : index
    %282 = vector.load %arg11[%c7_83, %c0_84, %c0_85] : memref<8x8x32xbf16, #tpu.memory_space<vmem>>, vector<1x8x32xbf16>
    %283 = vector.shape_cast %282 : vector<1x8x32xbf16> to vector<8x32xbf16>
    %284 = vector.shape_cast %281 : vector<8x32xbf16> to vector<1x8x32xbf16>
    tpu.vector_store %arg11[%c7_83, %c0_84, %c0_85], %284 {strides = array<i32>} : memref<8x8x32xbf16, #tpu.memory_space<vmem>>, vector<1x8x32xbf16>,
    %c0_86 = arith.constant 0 : index
    %c0_87 = arith.constant 0 : index
    %c0_88 = arith.constant 0 : index
    %285 = vector.load %arg11[%c0_86, %c0_87, %c0_88] : memref<8x8x32xbf16, #tpu.memory_space<vmem>>, vector<8x8x32xbf16>
    %286 = vector.shape_cast %285 : vector<8x8x32xbf16> to vector<64x32xbf16>
    %c0_89 = arith.constant 0 : index
    %c0_90 = arith.constant 0 : index
    %287 = vector.load %arg4[%c0_89, %c0_90] : memref<32x128xbf16, #tpu.memory_space<vmem>>, vector<32x128xbf16>
    %c0_91 = arith.constant 0 : index
    %c0_92 = arith.constant 0 : index
    %288 = vector.load %arg5[%c0_91, %c0_92] : memref<32x128xbf16, #tpu.memory_space<vmem>>, vector<32x128xbf16>
    %c0_93 = arith.constant 0 : index
    %c0_94 = arith.constant 0 : index
    %289 = vector.load %arg6[%c0_93, %c0_94] : memref<1x128xf32, #tpu.memory_space<vmem>>, vector<1x128xf32>
    %cst_95 = arith.constant dense<0.000000e+00> : vector<64x128xf32>
    %290 = tpu.matmul %286, %287, %cst_95 {dimension_numbers = #tpu.dot_dimension_numbers<[1], [0], [0], [1], [0, 0, 1, 1], [], []>} : vector<64x32xbf16>, vector<32x128xbf16>, vector<64x128xf32> -> vector<64x128xf32>
    %291 = vector.broadcast %289 : vector<1x128xf32> to vector<64x128xf32>
    %292 = arith.addf %290, %291 : vector<64x128xf32>
    %293 = vector.shape_cast %292 : vector<64x128xf32> to vector<8x8x128xf32>
    %c0_96 = arith.constant 0 : index
    %c0_97 = arith.constant 0 : index
    %c0_98 = arith.constant 0 : index
    %294 = vector.load %arg10[%c0_96, %c0_97, %c0_98] : memref<8x8x128xf32, #tpu.memory_space<vmem>>, vector<8x8x128xf32>
    tpu.vector_store %arg10[%c0_96, %c0_97, %c0_98], %293 {strides = array<i32>} : memref<8x8x128xf32, #tpu.memory_space<vmem>>, vector<8x8x128xf32>,
    %cst_99 = arith.constant 0.000000e+00 : f32
    %295 = vector.broadcast %cst_99 : f32 to vector<8x32xf32>
    %cst_100 = arith.constant 0.000000e+00 : f32
    %296 = vector.broadcast %cst_100 : f32 to vector<8x32xf32>
    %c0_101 = arith.constant 0 : index
    %c0_102 = arith.constant 0 : index
    %c0_103 = arith.constant 0 : index
    %297 = vector.load %arg10[%c0_101, %c0_102, %c0_103] : memref<8x8x128xf32, #tpu.memory_space<vmem>>, vector<1x8x128xf32>
    %298 = vector.shape_cast %297 : vector<1x8x128xf32> to vector<8x128xf32>
    %299 = arith.truncf %295 : vector<8x32xf32> to vector<8x32xbf16>
    %cst_104 = arith.constant dense<0.000000e+00> : vector<8x128xf32>
    %300 = tpu.matmul %299, %288, %cst_104 {dimension_numbers = #tpu.dot_dimension_numbers<[1], [0], [0], [1], [0, 0, 1, 1], [], []>} : vector<8x32xbf16>, vector<32x128xbf16>, vector<8x128xf32> -> vector<8x128xf32>
    %301 = arith.addf %298, %300 : vector<8x128xf32>
    %302 = vector.extract_strided_slice %301 {offsets = [0, 0], sizes = [8, 32], strides = [1, 1]} : vector<8x128xf32> to vector<8x32xf32>
    %303 = arith.negf %302 : vector<8x32xf32>
    %304 = math.exp %303 : vector<8x32xf32>
    %cst_105 = arith.constant 1.000000e+00 : f32
    %305 = vector.broadcast %cst_105 : f32 to vector<8x32xf32>
    %306 = arith.addf %305, %304 : vector<8x32xf32>
    %307 = arith.divf %305, %306 : vector<8x32xf32>
    %308 = vector.extract_strided_slice %301 {offsets = [0, 32], sizes = [8, 32], strides = [1, 1]} : vector<8x128xf32> to vector<8x32xf32>
    %309 = arith.negf %308 : vector<8x32xf32>
    %310 = math.exp %309 : vector<8x32xf32>
    %cst_106 = arith.constant 1.000000e+00 : f32
    %311 = vector.broadcast %cst_106 : f32 to vector<8x32xf32>
    %312 = arith.addf %311, %310 : vector<8x32xf32>
    %313 = arith.divf %311, %312 : vector<8x32xf32>
    %314 = vector.extract_strided_slice %301 {offsets = [0, 64], sizes = [8, 32], strides = [1, 1]} : vector<8x128xf32> to vector<8x32xf32>
    %315 = math.tanh %314 : vector<8x32xf32>
    %316 = vector.extract_strided_slice %301 {offsets = [0, 96], sizes = [8, 32], strides = [1, 1]} : vector<8x128xf32> to vector<8x32xf32>
    %317 = arith.negf %316 : vector<8x32xf32>
    %318 = math.exp %317 : vector<8x32xf32>
    %cst_107 = arith.constant 1.000000e+00 : f32
    %319 = vector.broadcast %cst_107 : f32 to vector<8x32xf32>
    %320 = arith.addf %319, %318 : vector<8x32xf32>
    %321 = arith.divf %319, %320 : vector<8x32xf32>
    %322 = arith.mulf %313, %296 : vector<8x32xf32>
    %323 = arith.mulf %307, %315 : vector<8x32xf32>
    %324 = arith.addf %322, %323 : vector<8x32xf32>
    %325 = math.tanh %324 : vector<8x32xf32>
    %326 = arith.mulf %321, %325 : vector<8x32xf32>
    %c1_108 = arith.constant 1 : index
    %c0_109 = arith.constant 0 : index
    %c0_110 = arith.constant 0 : index
    %327 = vector.load %arg10[%c1_108, %c0_109, %c0_110] : memref<8x8x128xf32, #tpu.memory_space<vmem>>, vector<1x8x128xf32>
    %328 = vector.shape_cast %327 : vector<1x8x128xf32> to vector<8x128xf32>
    %329 = arith.truncf %326 : vector<8x32xf32> to vector<8x32xbf16>
    %cst_111 = arith.constant dense<0.000000e+00> : vector<8x128xf32>
    %330 = tpu.matmul %329, %288, %cst_111 {dimension_numbers = #tpu.dot_dimension_numbers<[1], [0], [0], [1], [0, 0, 1, 1], [], []>} : vector<8x32xbf16>, vector<32x128xbf16>, vector<8x128xf32> -> vector<8x128xf32>
    %331 = arith.addf %328, %330 : vector<8x128xf32>
    %332 = vector.extract_strided_slice %331 {offsets = [0, 0], sizes = [8, 32], strides = [1, 1]} : vector<8x128xf32> to vector<8x32xf32>
    %333 = arith.negf %332 : vector<8x32xf32>
    %334 = math.exp %333 : vector<8x32xf32>
    %cst_112 = arith.constant 1.000000e+00 : f32
    %335 = vector.broadcast %cst_112 : f32 to vector<8x32xf32>
    %336 = arith.addf %335, %334 : vector<8x32xf32>
    %337 = arith.divf %335, %336 : vector<8x32xf32>
    %338 = vector.extract_strided_slice %331 {offsets = [0, 32], sizes = [8, 32], strides = [1, 1]} : vector<8x128xf32> to vector<8x32xf32>
    %339 = arith.negf %338 : vector<8x32xf32>
    %340 = math.exp %339 : vector<8x32xf32>
    %cst_113 = arith.constant 1.000000e+00 : f32
    %341 = vector.broadcast %cst_113 : f32 to vector<8x32xf32>
    %342 = arith.addf %341, %340 : vector<8x32xf32>
    %343 = arith.divf %341, %342 : vector<8x32xf32>
    %344 = vector.extract_strided_slice %331 {offsets = [0, 64], sizes = [8, 32], strides = [1, 1]} : vector<8x128xf32> to vector<8x32xf32>
    %345 = math.tanh %344 : vector<8x32xf32>
    %346 = vector.extract_strided_slice %331 {offsets = [0, 96], sizes = [8, 32], strides = [1, 1]} : vector<8x128xf32> to vector<8x32xf32>
    %347 = arith.negf %346 : vector<8x32xf32>
    %348 = math.exp %347 : vector<8x32xf32>
    %cst_114 = arith.constant 1.000000e+00 : f32
    %349 = vector.broadcast %cst_114 : f32 to vector<8x32xf32>
    %350 = arith.addf %349, %348 : vector<8x32xf32>
    %351 = arith.divf %349, %350 : vector<8x32xf32>
    %352 = arith.mulf %343, %324 : vector<8x32xf32>
    %353 = arith.mulf %337, %345 : vector<8x32xf32>
    %354 = arith.addf %352, %353 : vector<8x32xf32>
    %355 = math.tanh %354 : vector<8x32xf32>
    %356 = arith.mulf %351, %355 : vector<8x32xf32>
    %c2_115 = arith.constant 2 : index
    %c0_116 = arith.constant 0 : index
    %c0_117 = arith.constant 0 : index
    %357 = vector.load %arg10[%c2_115, %c0_116, %c0_117] : memref<8x8x128xf32, #tpu.memory_space<vmem>>, vector<1x8x128xf32>
    %358 = vector.shape_cast %357 : vector<1x8x128xf32> to vector<8x128xf32>
    %359 = arith.truncf %356 : vector<8x32xf32> to vector<8x32xbf16>
    %cst_118 = arith.constant dense<0.000000e+00> : vector<8x128xf32>
    %360 = tpu.matmul %359, %288, %cst_118 {dimension_numbers = #tpu.dot_dimension_numbers<[1], [0], [0], [1], [0, 0, 1, 1], [], []>} : vector<8x32xbf16>, vector<32x128xbf16>, vector<8x128xf32> -> vector<8x128xf32>
    %361 = arith.addf %358, %360 : vector<8x128xf32>
    %362 = vector.extract_strided_slice %361 {offsets = [0, 0], sizes = [8, 32], strides = [1, 1]} : vector<8x128xf32> to vector<8x32xf32>
    %363 = arith.negf %362 : vector<8x32xf32>
    %364 = math.exp %363 : vector<8x32xf32>
    %cst_119 = arith.constant 1.000000e+00 : f32
    %365 = vector.broadcast %cst_119 : f32 to vector<8x32xf32>
    %366 = arith.addf %365, %364 : vector<8x32xf32>
    %367 = arith.divf %365, %366 : vector<8x32xf32>
    %368 = vector.extract_strided_slice %361 {offsets = [0, 32], sizes = [8, 32], strides = [1, 1]} : vector<8x128xf32> to vector<8x32xf32>
    %369 = arith.negf %368 : vector<8x32xf32>
    %370 = math.exp %369 : vector<8x32xf32>
    %cst_120 = arith.constant 1.000000e+00 : f32
    %371 = vector.broadcast %cst_120 : f32 to vector<8x32xf32>
    %372 = arith.addf %371, %370 : vector<8x32xf32>
    %373 = arith.divf %371, %372 : vector<8x32xf32>
    %374 = vector.extract_strided_slice %361 {offsets = [0, 64], sizes = [8, 32], strides = [1, 1]} : vector<8x128xf32> to vector<8x32xf32>
    %375 = math.tanh %374 : vector<8x32xf32>
    %376 = vector.extract_strided_slice %361 {offsets = [0, 96], sizes = [8, 32], strides = [1, 1]} : vector<8x128xf32> to vector<8x32xf32>
    %377 = arith.negf %376 : vector<8x32xf32>
    %378 = math.exp %377 : vector<8x32xf32>
    %cst_121 = arith.constant 1.000000e+00 : f32
    %379 = vector.broadcast %cst_121 : f32 to vector<8x32xf32>
    %380 = arith.addf %379, %378 : vector<8x32xf32>
    %381 = arith.divf %379, %380 : vector<8x32xf32>
    %382 = arith.mulf %373, %354 : vector<8x32xf32>
    %383 = arith.mulf %367, %375 : vector<8x32xf32>
    %384 = arith.addf %382, %383 : vector<8x32xf32>
    %385 = math.tanh %384 : vector<8x32xf32>
    %386 = arith.mulf %381, %385 : vector<8x32xf32>
    %c3_122 = arith.constant 3 : index
    %c0_123 = arith.constant 0 : index
    %c0_124 = arith.constant 0 : index
    %387 = vector.load %arg10[%c3_122, %c0_123, %c0_124] : memref<8x8x128xf32, #tpu.memory_space<vmem>>, vector<1x8x128xf32>
    %388 = vector.shape_cast %387 : vector<1x8x128xf32> to vector<8x128xf32>
    %389 = arith.truncf %386 : vector<8x32xf32> to vector<8x32xbf16>
    %cst_125 = arith.constant dense<0.000000e+00> : vector<8x128xf32>
    %390 = tpu.matmul %389, %288, %cst_125 {dimension_numbers = #tpu.dot_dimension_numbers<[1], [0], [0], [1], [0, 0, 1, 1], [], []>} : vector<8x32xbf16>, vector<32x128xbf16>, vector<8x128xf32> -> vector<8x128xf32>
    %391 = arith.addf %388, %390 : vector<8x128xf32>
    %392 = vector.extract_strided_slice %391 {offsets = [0, 0], sizes = [8, 32], strides = [1, 1]} : vector<8x128xf32> to vector<8x32xf32>
    %393 = arith.negf %392 : vector<8x32xf32>
    %394 = math.exp %393 : vector<8x32xf32>
    %cst_126 = arith.constant 1.000000e+00 : f32
    %395 = vector.broadcast %cst_126 : f32 to vector<8x32xf32>
    %396 = arith.addf %395, %394 : vector<8x32xf32>
    %397 = arith.divf %395, %396 : vector<8x32xf32>
    %398 = vector.extract_strided_slice %391 {offsets = [0, 32], sizes = [8, 32], strides = [1, 1]} : vector<8x128xf32> to vector<8x32xf32>
    %399 = arith.negf %398 : vector<8x32xf32>
    %400 = math.exp %399 : vector<8x32xf32>
    %cst_127 = arith.constant 1.000000e+00 : f32
    %401 = vector.broadcast %cst_127 : f32 to vector<8x32xf32>
    %402 = arith.addf %401, %400 : vector<8x32xf32>
    %403 = arith.divf %401, %402 : vector<8x32xf32>
    %404 = vector.extract_strided_slice %391 {offsets = [0, 64], sizes = [8, 32], strides = [1, 1]} : vector<8x128xf32> to vector<8x32xf32>
    %405 = math.tanh %404 : vector<8x32xf32>
    %406 = vector.extract_strided_slice %391 {offsets = [0, 96], sizes = [8, 32], strides = [1, 1]} : vector<8x128xf32> to vector<8x32xf32>
    %407 = arith.negf %406 : vector<8x32xf32>
    %408 = math.exp %407 : vector<8x32xf32>
    %cst_128 = arith.constant 1.000000e+00 : f32
    %409 = vector.broadcast %cst_128 : f32 to vector<8x32xf32>
    %410 = arith.addf %409, %408 : vector<8x32xf32>
    %411 = arith.divf %409, %410 : vector<8x32xf32>
    %412 = arith.mulf %403, %384 : vector<8x32xf32>
    %413 = arith.mulf %397, %405 : vector<8x32xf32>
    %414 = arith.addf %412, %413 : vector<8x32xf32>
    %415 = math.tanh %414 : vector<8x32xf32>
    %416 = arith.mulf %411, %415 : vector<8x32xf32>
    %c4_129 = arith.constant 4 : index
    %c0_130 = arith.constant 0 : index
    %c0_131 = arith.constant 0 : index
    %417 = vector.load %arg10[%c4_129, %c0_130, %c0_131] : memref<8x8x128xf32, #tpu.memory_space<vmem>>, vector<1x8x128xf32>
    %418 = vector.shape_cast %417 : vector<1x8x128xf32> to vector<8x128xf32>
    %419 = arith.truncf %416 : vector<8x32xf32> to vector<8x32xbf16>
    %cst_132 = arith.constant dense<0.000000e+00> : vector<8x128xf32>
    %420 = tpu.matmul %419, %288, %cst_132 {dimension_numbers = #tpu.dot_dimension_numbers<[1], [0], [0], [1], [0, 0, 1, 1], [], []>} : vector<8x32xbf16>, vector<32x128xbf16>, vector<8x128xf32> -> vector<8x128xf32>
    %421 = arith.addf %418, %420 : vector<8x128xf32>
    %422 = vector.extract_strided_slice %421 {offsets = [0, 0], sizes = [8, 32], strides = [1, 1]} : vector<8x128xf32> to vector<8x32xf32>
    %423 = arith.negf %422 : vector<8x32xf32>
    %424 = math.exp %423 : vector<8x32xf32>
    %cst_133 = arith.constant 1.000000e+00 : f32
    %425 = vector.broadcast %cst_133 : f32 to vector<8x32xf32>
    %426 = arith.addf %425, %424 : vector<8x32xf32>
    %427 = arith.divf %425, %426 : vector<8x32xf32>
    %428 = vector.extract_strided_slice %421 {offsets = [0, 32], sizes = [8, 32], strides = [1, 1]} : vector<8x128xf32> to vector<8x32xf32>
    %429 = arith.negf %428 : vector<8x32xf32>
    %430 = math.exp %429 : vector<8x32xf32>
    %cst_134 = arith.constant 1.000000e+00 : f32
    %431 = vector.broadcast %cst_134 : f32 to vector<8x32xf32>
    %432 = arith.addf %431, %430 : vector<8x32xf32>
    %433 = arith.divf %431, %432 : vector<8x32xf32>
    %434 = vector.extract_strided_slice %421 {offsets = [0, 64], sizes = [8, 32], strides = [1, 1]} : vector<8x128xf32> to vector<8x32xf32>
    %435 = math.tanh %434 : vector<8x32xf32>
    %436 = vector.extract_strided_slice %421 {offsets = [0, 96], sizes = [8, 32], strides = [1, 1]} : vector<8x128xf32> to vector<8x32xf32>
    %437 = arith.negf %436 : vector<8x32xf32>
    %438 = math.exp %437 : vector<8x32xf32>
    %cst_135 = arith.constant 1.000000e+00 : f32
    %439 = vector.broadcast %cst_135 : f32 to vector<8x32xf32>
    %440 = arith.addf %439, %438 : vector<8x32xf32>
    %441 = arith.divf %439, %440 : vector<8x32xf32>
    %442 = arith.mulf %433, %414 : vector<8x32xf32>
    %443 = arith.mulf %427, %435 : vector<8x32xf32>
    %444 = arith.addf %442, %443 : vector<8x32xf32>
    %445 = math.tanh %444 : vector<8x32xf32>
    %446 = arith.mulf %441, %445 : vector<8x32xf32>
    %c5_136 = arith.constant 5 : index
    %c0_137 = arith.constant 0 : index
    %c0_138 = arith.constant 0 : index
    %447 = vector.load %arg10[%c5_136, %c0_137, %c0_138] : memref<8x8x128xf32, #tpu.memory_space<vmem>>, vector<1x8x128xf32>
    %448 = vector.shape_cast %447 : vector<1x8x128xf32> to vector<8x128xf32>
    %449 = arith.truncf %446 : vector<8x32xf32> to vector<8x32xbf16>
    %cst_139 = arith.constant dense<0.000000e+00> : vector<8x128xf32>
    %450 = tpu.matmul %449, %288, %cst_139 {dimension_numbers = #tpu.dot_dimension_numbers<[1], [0], [0], [1], [0, 0, 1, 1], [], []>} : vector<8x32xbf16>, vector<32x128xbf16>, vector<8x128xf32> -> vector<8x128xf32>
    %451 = arith.addf %448, %450 : vector<8x128xf32>
    %452 = vector.extract_strided_slice %451 {offsets = [0, 0], sizes = [8, 32], strides = [1, 1]} : vector<8x128xf32> to vector<8x32xf32>
    %453 = arith.negf %452 : vector<8x32xf32>
    %454 = math.exp %453 : vector<8x32xf32>
    %cst_140 = arith.constant 1.000000e+00 : f32
    %455 = vector.broadcast %cst_140 : f32 to vector<8x32xf32>
    %456 = arith.addf %455, %454 : vector<8x32xf32>
    %457 = arith.divf %455, %456 : vector<8x32xf32>
    %458 = vector.extract_strided_slice %451 {offsets = [0, 32], sizes = [8, 32], strides = [1, 1]} : vector<8x128xf32> to vector<8x32xf32>
    %459 = arith.negf %458 : vector<8x32xf32>
    %460 = math.exp %459 : vector<8x32xf32>
    %cst_141 = arith.constant 1.000000e+00 : f32
    %461 = vector.broadcast %cst_141 : f32 to vector<8x32xf32>
    %462 = arith.addf %461, %460 : vector<8x32xf32>
    %463 = arith.divf %461, %462 : vector<8x32xf32>
    %464 = vector.extract_strided_slice %451 {offsets = [0, 64], sizes = [8, 32], strides = [1, 1]} : vector<8x128xf32> to vector<8x32xf32>
    %465 = math.tanh %464 : vector<8x32xf32>
    %466 = vector.extract_strided_slice %451 {offsets = [0, 96], sizes = [8, 32], strides = [1, 1]} : vector<8x128xf32> to vector<8x32xf32>
    %467 = arith.negf %466 : vector<8x32xf32>
    %468 = math.exp %467 : vector<8x32xf32>
    %cst_142 = arith.constant 1.000000e+00 : f32
    %469 = vector.broadcast %cst_142 : f32 to vector<8x32xf32>
    %470 = arith.addf %469, %468 : vector<8x32xf32>
    %471 = arith.divf %469, %470 : vector<8x32xf32>
    %472 = arith.mulf %463, %444 : vector<8x32xf32>
    %473 = arith.mulf %457, %465 : vector<8x32xf32>
    %474 = arith.addf %472, %473 : vector<8x32xf32>
    %475 = math.tanh %474 : vector<8x32xf32>
    %476 = arith.mulf %471, %475 : vector<8x32xf32>
    %c6_143 = arith.constant 6 : index
    %c0_144 = arith.constant 0 : index
    %c0_145 = arith.constant 0 : index
    %477 = vector.load %arg10[%c6_143, %c0_144, %c0_145] : memref<8x8x128xf32, #tpu.memory_space<vmem>>, vector<1x8x128xf32>
    %478 = vector.shape_cast %477 : vector<1x8x128xf32> to vector<8x128xf32>
    %479 = arith.truncf %476 : vector<8x32xf32> to vector<8x32xbf16>
    %cst_146 = arith.constant dense<0.000000e+00> : vector<8x128xf32>
    %480 = tpu.matmul %479, %288, %cst_146 {dimension_numbers = #tpu.dot_dimension_numbers<[1], [0], [0], [1], [0, 0, 1, 1], [], []>} : vector<8x32xbf16>, vector<32x128xbf16>, vector<8x128xf32> -> vector<8x128xf32>
    %481 = arith.addf %478, %480 : vector<8x128xf32>
    %482 = vector.extract_strided_slice %481 {offsets = [0, 0], sizes = [8, 32], strides = [1, 1]} : vector<8x128xf32> to vector<8x32xf32>
    %483 = arith.negf %482 : vector<8x32xf32>
    %484 = math.exp %483 : vector<8x32xf32>
    %cst_147 = arith.constant 1.000000e+00 : f32
    %485 = vector.broadcast %cst_147 : f32 to vector<8x32xf32>
    %486 = arith.addf %485, %484 : vector<8x32xf32>
    %487 = arith.divf %485, %486 : vector<8x32xf32>
    %488 = vector.extract_strided_slice %481 {offsets = [0, 32], sizes = [8, 32], strides = [1, 1]} : vector<8x128xf32> to vector<8x32xf32>
    %489 = arith.negf %488 : vector<8x32xf32>
    %490 = math.exp %489 : vector<8x32xf32>
    %cst_148 = arith.constant 1.000000e+00 : f32
    %491 = vector.broadcast %cst_148 : f32 to vector<8x32xf32>
    %492 = arith.addf %491, %490 : vector<8x32xf32>
    %493 = arith.divf %491, %492 : vector<8x32xf32>
    %494 = vector.extract_strided_slice %481 {offsets = [0, 64], sizes = [8, 32], strides = [1, 1]} : vector<8x128xf32> to vector<8x32xf32>
    %495 = math.tanh %494 : vector<8x32xf32>
    %496 = vector.extract_strided_slice %481 {offsets = [0, 96], sizes = [8, 32], strides = [1, 1]} : vector<8x128xf32> to vector<8x32xf32>
    %497 = arith.negf %496 : vector<8x32xf32>
    %498 = math.exp %497 : vector<8x32xf32>
    %cst_149 = arith.constant 1.000000e+00 : f32
    %499 = vector.broadcast %cst_149 : f32 to vector<8x32xf32>
    %500 = arith.addf %499, %498 : vector<8x32xf32>
    %501 = arith.divf %499, %500 : vector<8x32xf32>
    %502 = arith.mulf %493, %474 : vector<8x32xf32>
    %503 = arith.mulf %487, %495 : vector<8x32xf32>
    %504 = arith.addf %502, %503 : vector<8x32xf32>
    %505 = math.tanh %504 : vector<8x32xf32>
    %506 = arith.mulf %501, %505 : vector<8x32xf32>
    %c7_150 = arith.constant 7 : index
    %c0_151 = arith.constant 0 : index
    %c0_152 = arith.constant 0 : index
    %507 = vector.load %arg10[%c7_150, %c0_151, %c0_152] : memref<8x8x128xf32, #tpu.memory_space<vmem>>, vector<1x8x128xf32>
    %508 = vector.shape_cast %507 : vector<1x8x128xf32> to vector<8x128xf32>
    %509 = arith.truncf %506 : vector<8x32xf32> to vector<8x32xbf16>
    %cst_153 = arith.constant dense<0.000000e+00> : vector<8x128xf32>
    %510 = tpu.matmul %509, %288, %cst_153 {dimension_numbers = #tpu.dot_dimension_numbers<[1], [0], [0], [1], [0, 0, 1, 1], [], []>} : vector<8x32xbf16>, vector<32x128xbf16>, vector<8x128xf32> -> vector<8x128xf32>
    %511 = arith.addf %508, %510 : vector<8x128xf32>
    %512 = vector.extract_strided_slice %511 {offsets = [0, 0], sizes = [8, 32], strides = [1, 1]} : vector<8x128xf32> to vector<8x32xf32>
    %513 = arith.negf %512 : vector<8x32xf32>
    %514 = math.exp %513 : vector<8x32xf32>
    %cst_154 = arith.constant 1.000000e+00 : f32
    %515 = vector.broadcast %cst_154 : f32 to vector<8x32xf32>
    %516 = arith.addf %515, %514 : vector<8x32xf32>
    %517 = arith.divf %515, %516 : vector<8x32xf32>
    %518 = vector.extract_strided_slice %511 {offsets = [0, 32], sizes = [8, 32], strides = [1, 1]} : vector<8x128xf32> to vector<8x32xf32>
    %519 = arith.negf %518 : vector<8x32xf32>
    %520 = math.exp %519 : vector<8x32xf32>
    %cst_155 = arith.constant 1.000000e+00 : f32
    %521 = vector.broadcast %cst_155 : f32 to vector<8x32xf32>
    %522 = arith.addf %521, %520 : vector<8x32xf32>
    %523 = arith.divf %521, %522 : vector<8x32xf32>
    %524 = vector.extract_strided_slice %511 {offsets = [0, 64], sizes = [8, 32], strides = [1, 1]} : vector<8x128xf32> to vector<8x32xf32>
    %525 = math.tanh %524 : vector<8x32xf32>
    %526 = vector.extract_strided_slice %511 {offsets = [0, 96], sizes = [8, 32], strides = [1, 1]} : vector<8x128xf32> to vector<8x32xf32>
    %527 = arith.negf %526 : vector<8x32xf32>
    %528 = math.exp %527 : vector<8x32xf32>
    %cst_156 = arith.constant 1.000000e+00 : f32
    %529 = vector.broadcast %cst_156 : f32 to vector<8x32xf32>
    %530 = arith.addf %529, %528 : vector<8x32xf32>
    %531 = arith.divf %529, %530 : vector<8x32xf32>
    %532 = arith.mulf %523, %504 : vector<8x32xf32>
    %533 = arith.mulf %517, %525 : vector<8x32xf32>
    %534 = arith.addf %532, %533 : vector<8x32xf32>
    %535 = math.tanh %534 : vector<8x32xf32>
    %536 = arith.mulf %531, %535 : vector<8x32xf32>
    %537 = arith.truncf %536 : vector<8x32xf32> to vector<8x32xbf16>
    %c0_157 = arith.constant 0 : index
    %c0_158 = arith.constant 0 : index
    %538 = vector.load %arg7[%c0_157, %c0_158] : memref<32x5xbf16, #tpu.memory_space<vmem>>, vector<32x5xbf16>
    %cst_159 = arith.constant dense<0.000000e+00> : vector<8x5xf32>
    %539 = tpu.matmul %537, %538, %cst_159 {dimension_numbers = #tpu.dot_dimension_numbers<[1], [0], [0], [1], [0, 0, 1, 1], [], []>} : vector<8x32xbf16>, vector<32x5xbf16>, vector<8x5xf32> -> vector<8x5xf32>
    %c0_160 = arith.constant 0 : index
    %c0_161 = arith.constant 0 : index
    %540 = vector.load %arg8[%c0_160, %c0_161] : memref<1x5xf32, #tpu.memory_space<vmem>>, vector<1x5xf32>
    %541 = vector.broadcast %540 : vector<1x5xf32> to vector<8x5xf32>
    %542 = arith.addf %539, %541 : vector<8x5xf32>
    %c0_162 = arith.constant 0 : index
    %c0_163 = arith.constant 0 : index
    %543 = vector.load %arg9[%c0_162, %c0_163] : memref<8x5xf32, #tpu.memory_space<vmem>>, vector<8x5xf32>
    tpu.vector_store %arg9[%c0_162, %c0_163], %542 {strides = array<i32>} : memref<8x5xf32, #tpu.memory_space<vmem>>, vector<8x5xf32>,
    return
  }
}

</mosaic_0001>

<bundles_post_ra>
// kernel: lstm_submodel_forward.1
= control target key start
LH: loop header
LB: loop body
LE: loop exit
PB: predicated region body
PF: predicated region fallthrough
CT: control target
= control target key end

     0   :  { %v2082_v0 = vmov 0.0   ;;  %vm2083_vm0 = vmmov 0   ;;  %vm88_vm1 = vcmask 130048   ;;  %v2084_v10 = vmov 0   ;;  %s2085_s23 = smov 64   ;;  %s2503_s1 = inlined_call_operand.vmem [shape: bf16[16,128], index: 1, kind: input, shape index: {}]   ;;  %s2504_s2 = inlined_call_operand.vmem [shape: bf16[32,128], index: 2, kind: input, shape index: {}]   ;;  %s2505_s0 = inlined_call_operand.vmem [shape: f32[8,8,16], index: 0, kind: input, shape index: {}]   ;;  %s2506_s3 = inlined_call_operand.vmem [shape: f32[1,128], index: 3, kind: input, shape index: {}]   ;;  %s2507_s4 = inlined_call_operand.vmem [shape: bf16[32,128], index: 4, kind: input, shape index: {}]   ;;  %s2508_s5 = inlined_call_operand.vmem [shape: bf16[32,128], index: 5, kind: input, shape index: {}]   ;;  %s2509_s6 = inlined_call_operand.vmem [shape: f32[1,128], index: 6, kind: input, shape index: {}]   ;;  %s2510_s7 = inlined_call_operand.vmem [shape: bf16[32,5], index: 7, kind: input, shape index: {}]   ;;  %s2511_s8 = inlined_call_operand.vmem [shape: f32[1,5], index: 8, kind: input, shape index: {}]   ;;  %s2512_s9 = inlined_call_operand.vmem [shape: f32[8,5], index: 9, kind: output, shape index: {}]  }
   0x1   :  { %1788 = vmatprep.subr.bf16.mxu1 %v2082_v0  ;;  %v1941_v1 = vld [vmem:[%s2503_s1] sm:$0xff]   ;;  %1792 = vmatprep.mubr.msk.bf16.mxu1 %vm2083_vm0, %v2082_v0  ;;  %v34_v4 = vld [vmem:[%s2505_s0 + $0x8] sm:$0xff]  ;;  %v35_v5 = vld [vmem:[%s2505_s0 + $0x10] sm:$0xff]  ;;  %vm187_vm2 = vcmask 261120   ;;  %vm263_vm3 = vcmask 257024   ;;  %vm1631_vm4 = vcmask 39936  }
   0x2   :  { %v2146_v2 = vld [vmem:[%s2504_s2] sm:$0xff]   ;;  %1778 = vmatprep.subr.bf16.mxu0 %v1941_v1  ;;  %v36_v7 = vld [vmem:[%s2505_s0 + $0x18] sm:$0xff]  ;;  %v2165_v9 = vld [vmem:[%s2504_s2 + $0x8] sm:$0xff]  }
   0x3   :  { %v33_v3 = vld [vmem:[%s2505_s0] sm:$0xff]  ;;  %1789 = vmatpush3.bf16.msra.mxu1 %v2146_v2  ;;  %1779 = vmatpush3.bf16.msra.mxu0 %v1941_v1  ;;  %v1705_v8 = vpack.c.bf16 %v36_v7, %v35_v5  ;;  %v38_v54 = vld [vmem:[%s2505_s0 + $0x28] sm:$0xff]  ;;  %v39_v55 = vld [vmem:[%s2505_s0 + $0x30] sm:$0xff] }
   0x4   :  { %v1704_v6 = vpack.c.bf16 %v34_v4, %v33_v3  ;;  %1790 = vmatprep.subr.bf16.mxu1 %v2082_v0  ;;  %1804 = vmatprep.subr.bf16.mxu0 %v2082_v0  ;;  %v2186_v11 = vld [vmem:[%s2506_s3] ss:$0 sm:$0xff]  ;;  %s2086_s3 = smov 32   ;;  %v40_v57 = vld [vmem:[%s2505_s0 + $0x38] sm:$0xff] }
   0x5   :  { %v37_v53 = vld [vmem:[%s2505_s0 + $0x20] sm:$0xff]  ;;  %v1707_v58 = vpack.c.bf16 %v40_v57, %v39_v55 }
   0x6   :  { %1780 = vmatprep.mubr.msk.bf16.mxu0 %vm88_vm1, %v1704_v6  ;;  %v1706_v56 = vpack.c.bf16 %v38_v54, %v37_v53 }
   0x7   :  { %1781 = vmatmul.mubr.msk.bf16.vlgmr.msra.gmra.mrb[0].mxu0 %vm88_vm1, %v1705_v8  ;;  %1791 = vmatpush3.bf16.msra.mxu1 %v2165_v9 }
   0x8   :  { %1805 = vmatpush3.bf16.msra.mxu0 %v2146_v2  ;;  %1796 = vmatprep.subr.bf16.mxu1 %v2082_v0 }
   0x9   :  { %1806 = vmatprep.subr.bf16.mxu0 %v2082_v0  ;;  %1784 = vmatprep.mubr.msk.bf16.mxu0 %vm88_vm1, %v1706_v56 }
   0xa   :  { %1793 = vmatmul.mubr.bf16.vlgmr.msra.gmra.mrb[0].mxu1 %v2084_v10 }
   0xb   :  { %1797 = vmatpush3.bf16.msra.mxu1 %v2146_v2  ;;  %1800 = vmatprep.mubr.msk.bf16.mxu1 %vm2083_vm0, %v2082_v0 }
   0xc   :  { %1798 = vmatprep.subr.bf16.mxu1 %v2082_v0  ;;  %1807 = vmatpush3.bf16.msra.mxu0 %v2165_v9 }
   0xd   :  { %1820 = vmatprep.subr.bf16.mxu0 %v2082_v0 }
   0xf   :  { %1799 = vmatpush3.bf16.msra.mxu1 %v2165_v9  ;;  %1785 = vmatmul.mubr.msk.bf16.gmra.mrb[4].mxu0 %vm88_vm1, %v1707_v58 }
  0x10   :  { %1812 = vmatprep.subr.bf16.mxu1 %v2082_v0  ;;  %1808 = vmatprep.mubr.msk.bf16.mxu0 %vm2083_vm0, %v2082_v0 }
  0xda   :  { %v2188_v12 = vpop.f32.mrb[0].mxu0 }
  0xdb   :  { %v135_v13 = vpop.f32.mrb[1].mxu0  ;;  %v144_v6 = vadd.f32 %v2188_v12, %v2186_v11 }
  0xdc   :  { %v136_v14 = vadd.f32 %v2186_v11, %v135_v13  ;;  %v2191_v15 = vpop.f32.mrb[2].mxu0 }
  0xdd   :  { %v138_v16 = vpop.f32.mrb[3].mxu0  ;;  %v225_v17 = vpop.f32.mrb[0].mxu1 }
  0xde   :  { %v231_v18 = vadd.f32 %v225_v17, %v136_v14  ;;  %v1794_v19 = vpop.f32.mrb[1].mxu1  ;;  %v139_v37 = vadd.f32 %v2186_v11, %v138_v16 }
  0xdf   :  { %v228_v20 = vpop.f32.mrb[2].mxu1 }
  0xe0   :  { %1954 = vtanh.f32 %v231_v18  ;;  %v1795_v21 = vpop.f32.mrb[3].mxu1  ;;  %v1649_v23 = vmul.f32 -1.442695, %v231_v18 }
  0xe2   :  { %1956 = vpow2.f32 %v1649_v23  ;;  %v2231_v63 = vpop.f32.mrb[4].mxu0 }
  0xe3   :  { %v2233_v1 = vpop.f32.mrb[5].mxu0 }
  0xe4   :  { %v2235_v3 = vpop.f32.mrb[6].mxu0 }
  0xe5   :  { %v2237_v4 = vpop.f32.mrb[7].mxu0 }
  0xea   :  { %v1955_v22 = vpop.eup %1954 }
  0xeb   :  { %241 = vrot.lane.b32.xlu0 %v1955_v22, %s2085_s23 }
  0xec   :  { %v1957_v24 = vpop.eup %1956 }
  0xed   :  { %v235_v25 = vadd.f32 1.0, %v1957_v24 }
  0xef   :  { %1958 = vrcp.f32 %v235_v25 }
  0xf9   :  { %v1959_v26 = vpop.eup %1958 }
  0xfa   :  { %v239_v29 = vmul.f32 0.0, %v1959_v26 }
 0x15d   :  { %v242_v27 = vpop.permute.xlu0 %241 }
 0x15e   :  { %v244_v28 = vmul.f32 %v1959_v26, %v242_v27 }
 0x160   :  { %246 = vrot.lane.b32.xlu0 %v244_v28, %s2086_s3 }
 0x1d2   :  { %v247_v30 = vpop.permute.xlu0 %246 }
 0x1d3   :  { %v249_v31 = vadd.f32 %v247_v30, %v239_v29 }
 0x1d5   :  { %1960 = vtanh.f32 %v249_v31 }
 0x1df   :  { %v1961_v32 = vpop.eup %1960 }
 0x1e0   :  { %252 = vrot.lane.b32.xlu1 %v1961_v32, %s2085_s23 }
 0x252   :  { %v253_v33 = vpop.permute.xlu1 %252 }
 0x253   :  { %v255_v34 = vmul.f32 %v1959_v26, %v253_v33 }
 0x255   :  { %v2196_v35 = vpack.c.bf16 %v255_v34, %v255_v34 }
 0x257   :  { %267 = vrot.lane.b32.xlu1 %v2196_v35, %s2086_s3 }
 0x2c9   :  { %v268_v36 = vpop.permute.xlu1 %267 }
 0x2ca   :  { %1801 = vmatmul.mubr.msk.bf16.vlgmr.msra.gmra.mrb[4].mxu1 %vm187_vm2, %v268_v36 }
 0x2cb   :  { %1813 = vmatpush3.bf16.msra.mxu1 %v2146_v2  ;;  %1816 = vmatprep.mubr.msk.bf16.mxu1 %vm2083_vm0, %v2082_v0 }
 0x2cc   :  { %1814 = vmatprep.subr.bf16.mxu1 %v2082_v0 }
 0x2cf   :  { %1815 = vmatpush3.bf16.msra.mxu1 %v2165_v9 }
 0x2d0   :  { %1828 = vmatprep.subr.bf16.mxu1 %v2082_v0 }
 0x39d   :  { %v306_v38 = vpop.f32.mrb[4].mxu1 }
 0x39e   :  { %v312_v39 = vadd.f32 %v306_v38, %v139_v37  ;;  %v1802_v40 = vpop.f32.mrb[5].mxu1 }
 0x39f   :  { %v309_v41 = vpop.f32.mrb[6].mxu1 }
 0x3a0   :  { %1962 = vtanh.f32 %v312_v39  ;;  %v1803_v42 = vpop.f32.mrb[7].mxu1  ;;  %v1652_v44 = vmul.f32 -1.442695, %v312_v39 }
 0x3a2   :  { %1964 = vpow2.f32 %v1652_v44 }
 0x3aa   :  { %v1963_v43 = vpop.eup %1962 }
 0x3ab   :  { %322 = vrot.lane.b32.xlu0 %v1963_v43, %s2085_s23 }
 0x3ac   :  { %v1965_v45 = vpop.eup %1964 }
 0x3ad   :  { %v316_v46 = vadd.f32 1.0, %v1965_v45 }
 0x3af   :  { %1966 = vrcp.f32 %v316_v46 }
 0x3b9   :  { %v1967_v47 = vpop.eup %1966 }
 0x3ba   :  { %v320_v50 = vmul.f32 %v1967_v47, %v249_v31  ;;  %v147_v31 = vadd.f32 %v2191_v15, %v2186_v11 }
 0x41d   :  { %v323_v48 = vpop.permute.xlu0 %322 }
 0x41e   :  { %v325_v49 = vmul.f32 %v1967_v47, %v323_v48 }
 0x420   :  { %327 = vrot.lane.b32.xlu1 %v325_v49, %s2086_s3 }
 0x492   :  { %v328_v51 = vpop.permute.xlu1 %327 }
 0x493   :  { %v330_v52 = vadd.f32 %v328_v51, %v320_v50 }
 0x495   :  { %1968 = vtanh.f32 %v330_v52 }
 0x49f   :  { %v1969_v59 = vpop.eup %1968 }
 0x4a0   :  { %333 = vrot.lane.b32.xlu0 %v1969_v59, %s2085_s23 }
 0x512   :  { %v334_v60 = vpop.permute.xlu0 %333 }
 0x513   :  { %v336_v61 = vmul.f32 %v1967_v47, %v334_v60 }
 0x515   :  { %v2227_v62 = vpack.c.bf16 %v336_v61, %v336_v61 }
 0x517   :  { %348 = vrot.lane.b32.xlu1 %v2227_v62, %s2086_s3 }
 0x589   :  { %v349_v5 = vpop.permute.xlu1 %348 }
 0x58a   :  { %1809 = vmatmul.mubr.msk.bf16.vlgmr.msra.gmra.mrb[8].mxu0 %vm187_vm2, %v349_v5 }
 0x58b   :  { %1821 = vmatpush3.bf16.msra.mxu0 %v2146_v2  ;;  %1824 = vmatprep.mubr.msk.bf16.mxu0 %vm2083_vm0, %v2082_v0 }
 0x58c   :  { %1822 = vmatprep.subr.bf16.mxu0 %v2082_v0 }
 0x58f   :  { %1823 = vmatpush3.bf16.msra.mxu0 %v2165_v9 }
 0x590   :  { %1836 = vmatprep.subr.bf16.mxu0 %v2082_v0 }
 0x65d   :  { %v387_v7 = vpop.f32.mrb[8].mxu0 }
 0x65e   :  { %v393_v8 = vadd.f32 %v387_v7, %v144_v6  ;;  %v1810_v13 = vpop.f32.mrb[9].mxu0 }
 0x65f   :  { %v390_v14 = vpop.f32.mrb[10].mxu0 }
 0x660   :  { %1970 = vtanh.f32 %v393_v8  ;;  %v1811_v16 = vpop.f32.mrb[11].mxu0  ;;  %v1655_v18 = vmul.f32 -1.442695, %v393_v8 }
 0x662   :  { %1972 = vpow2.f32 %v1655_v18 }
 0x66a   :  { %v1971_v17 = vpop.eup %1970 }
 0x66b   :  { %403 = vrot.lane.b32.xlu0 %v1971_v17, %s2085_s23 }
 0x66c   :  { %v1973_v19 = vpop.eup %1972 }
 0x66d   :  { %v397_v20 = vadd.f32 1.0, %v1973_v19 }
 0x66f   :  { %1974 = vrcp.f32 %v397_v20  ;;  %v155_v20 = vadd.f32 %v2186_v11, %v2237_v4 }
 0x679   :  { %v1975_v21 = vpop.eup %1974 }
 0x67a   :  { %v401_v12 = vmul.f32 %v1975_v21, %v330_v52  ;;  %v152_v52 = vadd.f32 %v2186_v11, %v2233_v1 }
 0x6dd   :  { %v404_v22 = vpop.permute.xlu0 %403 }
 0x6de   :  { %v406_v23 = vmul.f32 %v1975_v21, %v404_v22 }
 0x6e0   :  { %408 = vrot.lane.b32.xlu1 %v406_v23, %s2086_s3 }
 0x752   :  { %v409_v24 = vpop.permute.xlu1 %408 }
 0x753   :  { %v411_v25 = vadd.f32 %v409_v24, %v401_v12 }
 0x755   :  { %1976 = vtanh.f32 %v411_v25 }
 0x75f   :  { %v1977_v26 = vpop.eup %1976 }
 0x760   :  { %414 = vrot.lane.b32.xlu0 %v1977_v26, %s2085_s23 }
 0x7d2   :  { %v415_v27 = vpop.permute.xlu0 %414 }
 0x7d3   :  { %v417_v28 = vmul.f32 %v1975_v21, %v415_v27 }
 0x7d5   :  { %v2251_v29 = vpack.c.bf16 %v417_v28, %v417_v28 }
 0x7d7   :  { %429 = vrot.lane.b32.xlu1 %v2251_v29, %s2086_s3 }
 0x849   :  { %v430_v30 = vpop.permute.xlu1 %429 }
 0x84a   :  { %1817 = vmatmul.mubr.msk.bf16.vlgmr.msra.gmra.mrb[8].mxu1 %vm187_vm2, %v430_v30 }
 0x84b   :  { %1829 = vmatpush3.bf16.msra.mxu1 %v2146_v2  ;;  %1832 = vmatprep.mubr.msk.bf16.mxu1 %vm2083_vm0, %v2082_v0 }
 0x84c   :  { %1830 = vmatprep.subr.bf16.mxu1 %v2082_v0 }
 0x84f   :  { %1831 = vmatpush3.bf16.msra.mxu1 %v2165_v9 }
 0x850   :  { %1844 = vmatprep.subr.bf16.mxu1 %v2082_v0 }
 0x91d   :  { %v468_v32 = vpop.f32.mrb[8].mxu1 }
 0x91e   :  { %v474_v33 = vadd.f32 %v468_v32, %v147_v31  ;;  %v1818_v34 = vpop.f32.mrb[9].mxu1 }
 0x91f   :  { %v471_v36 = vpop.f32.mrb[10].mxu1 }
 0x920   :  { %1978 = vtanh.f32 %v474_v33  ;;  %v1819_v37 = vpop.f32.mrb[11].mxu1  ;;  %v1658_v39 = vmul.f32 -1.442695, %v474_v33 }
 0x922   :  { %1980 = vpow2.f32 %v1658_v39  ;;  %v160_v39 = vadd.f32 %v2231_v63, %v2186_v11 }
 0x92a   :  { %v1979_v38 = vpop.eup %1978 }
 0x92b   :  { %484 = vrot.lane.b32.xlu0 %v1979_v38, %s2085_s23 }
 0x92c   :  { %v1981_v40 = vpop.eup %1980 }
 0x92d   :  { %v478_v41 = vadd.f32 1.0, %v1981_v40 }
 0x92f   :  { %1982 = vrcp.f32 %v478_v41 }
 0x939   :  { %v1983_v42 = vpop.eup %1982 }
 0x93a   :  { %v482_v15 = vmul.f32 %v1983_v42, %v411_v25 }
 0x99d   :  { %v485_v43 = vpop.permute.xlu0 %484 }
 0x99e   :  { %v487_v44 = vmul.f32 %v1983_v42, %v485_v43 }
 0x9a0   :  { %489 = vrot.lane.b32.xlu1 %v487_v44, %s2086_s3 }
 0xa12   :  { %v490_v45 = vpop.permute.xlu1 %489 }
 0xa13   :  { %v492_v46 = vadd.f32 %v490_v45, %v482_v15 }
 0xa15   :  { %1984 = vtanh.f32 %v492_v46 }
 0xa1f   :  { %v1985_v47 = vpop.eup %1984 }
 0xa20   :  { %495 = vrot.lane.b32.xlu0 %v1985_v47, %s2085_s23 }
 0xa92   :  { %v496_v48 = vpop.permute.xlu0 %495 }
 0xa93   :  { %v498_v49 = vmul.f32 %v1983_v42, %v496_v48 }
 0xa95   :  { %v2267_v50 = vpack.c.bf16 %v498_v49, %v498_v49 }
 0xa97   :  { %510 = vrot.lane.b32.xlu1 %v2267_v50, %s2086_s3 }
 0xb09   :  { %v511_v51 = vpop.permute.xlu1 %510 }
 0xb0a   :  { %1825 = vmatmul.mubr.msk.bf16.vlgmr.msra.gmra.mrb[12].mxu0 %vm187_vm2, %v511_v51 }
 0xb0b   :  { %1837 = vmatpush3.bf16.msra.mxu0 %v2146_v2  ;;  %1840 = vmatprep.mubr.msk.bf16.mxu0 %vm2083_vm0, %v2082_v0 }
 0xb0c   :  { %1838 = vmatprep.subr.bf16.mxu0 %v2082_v0 }
 0xb0f   :  { %1839 = vmatpush3.bf16.msra.mxu0 %v2165_v9 }
 0xbdd   :  { %v549_v53 = vpop.f32.mrb[12].mxu0 }
 0xbde   :  { %v555_v54 = vadd.f32 %v549_v53, %v152_v52  ;;  %v1826_v55 = vpop.f32.mrb[13].mxu0 }
 0xbdf   :  { %v552_v56 = vpop.f32.mrb[14].mxu0 }
 0xbe0   :  { %1986 = vtanh.f32 %v555_v54  ;;  %v1827_v57 = vpop.f32.mrb[15].mxu0  ;;  %v1661_v59 = vmul.f32 -1.442695, %v555_v54  ;;  %v1944_v56 = vld [vmem:[%s2507_s4] sm:$0xff]  }
 0xbe1   :  { %1852 = vmatprep.subr.bf16.mxu0 %v1944_v56 }
 0xbe2   :  { %1988 = vpow2.f32 %v1661_v59 }
 0xbea   :  { %v1987_v58 = vpop.eup %1986 }
 0xbeb   :  { %565 = vrot.lane.b32.xlu0 %v1987_v58, %s2085_s23 }
 0xbec   :  { %v1989_v60 = vpop.eup %1988 }
 0xbed   :  { %v559_v61 = vadd.f32 1.0, %v1989_v60 }
 0xbef   :  { %1990 = vrcp.f32 %v559_v61 }
 0xbf9   :  { %v1991_v5 = vpop.eup %1990 }
 0xbfa   :  { %v563_v1 = vmul.f32 %v1991_v5, %v492_v46 }
 0xc5d   :  { %v566_v6 = vpop.permute.xlu0 %565 }
 0xc5e   :  { %v568_v7 = vmul.f32 %v1991_v5, %v566_v6  ;;  %v2346_v6 = vld [vmem:[%s2508_s5 + $0x8] sm:$0xff]  }
 0xc60   :  { %570 = vrot.lane.b32.xlu1 %v568_v7, %s2086_s3 }
 0xcd2   :  { %v571_v8 = vpop.permute.xlu1 %570 }
 0xcd3   :  { %v573_v13 = vadd.f32 %v571_v8, %v563_v1 }
 0xcd5   :  { %1992 = vtanh.f32 %v573_v13 }
 0xcdf   :  { %v1993_v14 = vpop.eup %1992 }
 0xce0   :  { %576 = vrot.lane.b32.xlu0 %v1993_v14, %s2085_s23 }
 0xd52   :  { %v577_v16 = vpop.permute.xlu0 %576 }
 0xd53   :  { %v579_v17 = vmul.f32 %v1991_v5, %v577_v16 }
 0xd55   :  { %v2282_v18 = vpack.c.bf16 %v579_v17, %v579_v17 }
 0xd57   :  { %591 = vrot.lane.b32.xlu1 %v2282_v18, %s2086_s3 }
 0xdc9   :  { %v592_v19 = vpop.permute.xlu1 %591 }
 0xdca   :  { %1833 = vmatmul.mubr.msk.bf16.vlgmr.msra.gmra.mrb[12].mxu1 %vm187_vm2, %v592_v19 }
 0xdcb   :  { %1845 = vmatpush3.bf16.msra.mxu1 %v2146_v2  ;;  %1848 = vmatprep.mubr.msk.bf16.mxu1 %vm2083_vm0, %v2082_v0 }
 0xdcc   :  { %1846 = vmatprep.subr.bf16.mxu1 %v2082_v0 }
 0xdcf   :  { %1847 = vmatpush3.bf16.msra.mxu1 %v2165_v9 }
 0xdd0   :  { %1864 = vmatprep.subr.bf16.mxu1 %v2082_v0 }
 0xe9d   :  { %v630_v21 = vpop.f32.mrb[12].mxu1 }
 0xe9e   :  { %v636_v22 = vadd.f32 %v630_v21, %v155_v20  ;;  %v1834_v23 = vpop.f32.mrb[13].mxu1 }
 0xe9f   :  { %v633_v12 = vpop.f32.mrb[14].mxu1 }
 0xea0   :  { %1994 = vtanh.f32 %v636_v22  ;;  %v1835_v24 = vpop.f32.mrb[15].mxu1  ;;  %v1664_v2 = vmul.f32 -1.442695, %v636_v22  ;;  %v2375_v22 = vld [vmem:[%s2509_s6] ss:$0 sm:$0xff] }
 0xea2   :  { %1996 = vpow2.f32 %v1664_v2 }
 0xeaa   :  { %v1995_v25 = vpop.eup %1994 }
 0xeab   :  { %646 = vrot.lane.b32.xlu0 %v1995_v25, %s2085_s23 }
 0xeac   :  { %v1997_v26 = vpop.eup %1996 }
 0xead   :  { %v640_v27 = vadd.f32 1.0, %v1997_v26 }
 0xeaf   :  { %1998 = vrcp.f32 %v640_v27 }
 0xeb9   :  { %v1999_v9 = vpop.eup %1998 }
 0xeba   :  { %v644_v4 = vmul.f32 %v1999_v9, %v573_v13 }
 0xf1d   :  { %v647_v28 = vpop.permute.xlu0 %646 }
 0xf1e   :  { %v649_v30 = vmul.f32 %v1999_v9, %v647_v28 }
 0xf20   :  { %651 = vrot.lane.b32.xlu1 %v649_v30, %s2086_s3 }
 0xf92   :  { %v652_v31 = vpop.permute.xlu1 %651 }
 0xf93   :  { %v654_v32 = vadd.f32 %v652_v31, %v644_v4 }
 0xf95   :  { %2000 = vtanh.f32 %v654_v32 }
 0xf9f   :  { %v2001_v33 = vpop.eup %2000 }
 0xfa0   :  { %657 = vrot.lane.b32.xlu0 %v2001_v33, %s2085_s23 }
0x1012   :  { %v658_v34 = vpop.permute.xlu0 %657 }
0x1013   :  { %v660_v36 = vmul.f32 %v1999_v9, %v658_v34 }
0x1015   :  { %v2298_v37 = vpack.c.bf16 %v660_v36, %v660_v36 }
0x1017   :  { %672 = vrot.lane.b32.xlu1 %v2298_v37, %s2086_s3 }
0x1089   :  { %v673_v38 = vpop.permute.xlu1 %672 }
0x108a   :  { %1841 = vmatmul.mubr.msk.bf16.vlgmr.msra.gmra.mrb[16].mxu0 %vm187_vm2, %v673_v38 }
0x108b   :  { %1853 = vmatpush3.bf16.msra.mxu0 %v1944_v56 }
0x115d   :  { %v711_v40 = vpop.f32.mrb[16].mxu0 }
0x115e   :  { %v717_v41 = vadd.f32 %v711_v40, %v160_v39  ;;  %v1842_v42 = vpop.f32.mrb[17].mxu0 }
0x115f   :  { %v714_v43 = vpop.f32.mrb[18].mxu0 }
0x1160   :  { %2002 = vtanh.f32 %v717_v41  ;;  %v1843_v44 = vpop.f32.mrb[19].mxu0  ;;  %v1667_v45 = vmul.f32 -1.442695, %v717_v41 }
0x1162   :  { %2004 = vpow2.f32 %v1667_v45 }
0x116a   :  { %v2003_v15 = vpop.eup %2002 }
0x116b   :  { %727 = vrot.lane.b32.xlu0 %v2003_v15, %s2085_s23 }
0x116c   :  { %v2005_v46 = vpop.eup %2004 }
0x116d   :  { %v721_v47 = vadd.f32 1.0, %v2005_v46 }
0x116f   :  { %2006 = vrcp.f32 %v721_v47 }
0x1179   :  { %v2007_v48 = vpop.eup %2006 }
0x117a   :  { %v725_v63 = vmul.f32 %v2007_v48, %v654_v32 }
0x11dd   :  { %v728_v49 = vpop.permute.xlu0 %727 }
0x11de   :  { %v730_v51 = vmul.f32 %v2007_v48, %v728_v49 }
0x11e0   :  { %732 = vrot.lane.b32.xlu1 %v730_v51, %s2086_s3 }
0x11e4   :  { %260 = vrot.lane.b32.xlu1 %v2196_v35, %s2086_s3  ;;  %v1945_v35 = vld [vmem:[%s2507_s4 + $0x8] sm:$0xff]  }
0x11e5   :  { %1854 = vmatprep.subr.bf16.mxu0 %v1945_v35 }
0x11e6   :  { %1855 = vmatpush3.bf16.msra.mxu0 %v1945_v35 }
0x11e7   :  { %1880 = vmatprep.subr.bf16.mxu0 %v2082_v0 }
0x11e8   :  { %422 = vrot.lane.b32.xlu1 %v2251_v29, %s2086_s3 }
0x1252   :  { %v733_v52 = vpop.permute.xlu1 %732 }
0x1253   :  { %v2311_v53 = vadd.f32 %v733_v52, %v725_v63 }
0x1255   :  { %2008 = vtanh.f32 %v2311_v53 }
0x1256   :  { %v261_v54 = vpop.permute.xlu1 %260 }
0x1257   :  { %264 = vst.msk [vmem:[#allocation3] sm:$0xf] %vm263_vm3, %v261_v54 }
0x125a   :  { %v423_v55 = vpop.permute.xlu1 %422 }
0x125b   :  { %426 = vst.msk [vmem:[#allocation3 + $0x8] sm:$0xf] %vm263_vm3, %v423_v55 }
0x125f   :  { %v2009_v29 = vpop.eup %2008 }
0x1260   :  { %738 = vrot.lane.b32.xlu0 %v2009_v29, %s2085_s23 }
0x1264   :  { %341 = vrot.lane.b32.xlu0 %v2227_v62, %s2086_s3 }
0x1268   :  { %503 = vrot.lane.b32.xlu0 %v2267_v50, %s2086_s3  ;;  %v2338_v50 = vld [vmem:[%s2508_s5] sm:$0xff]  }
0x12d2   :  { %v739_v57 = vpop.permute.xlu0 %738 }
0x12d3   :  { %v741_v58 = vmul.f32 %v2007_v48, %v739_v57 }
0x12d5   :  { %v2328_v59 = vpack.c.bf16 %v741_v58, %v741_v58 }
0x12d6   :  { %v342_v60 = vpop.permute.xlu0 %341 }
0x12d7   :  { %345 = vst.msk [vmem:[#allocation3 + $0x4] sm:$0xf] %vm263_vm3, %v342_v60  ;;  %753 = vrot.lane.b32.xlu1 %v2328_v59, %s2086_s3 }
0x12da   :  { %v504_v61 = vpop.permute.xlu0 %503 }
0x12db   :  { %507 = vst.msk [vmem:[#allocation3 + $0xc] sm:$0xf] %vm263_vm3, %v504_v61 }
0x12de   :  { %v1946_v5 = vld [vmem:[#allocation3] sm:$0xff]  }
0x12df   :  { %1856 = vmatprep.mubr.msk.bf16.mxu0 %vm187_vm2, %v1946_v5 }
0x12e2   :  { %v1947_v62 = vld [vmem:[#allocation3 + $0x8] sm:$0xff]  }
0x12e3   :  { %1857 = vmatmul.mubr.msk.bf16.vlgmr.msra.gmra.mrb[20].mxu0 %vm187_vm2, %v1947_v62 }
0x12e4   :  { %1881 = vmatpush3.bf16.msra.mxu0 %v2338_v50 }
0x12e5   :  { %1882 = vmatprep.subr.bf16.mxu0 %v2082_v0 }
0x12e8   :  { %1883 = vmatpush3.bf16.msra.mxu0 %v2346_v6 }
0x12e9   :  { %1896 = vmatprep.subr.bf16.mxu0 %v2082_v0 }
0x1349   :  { %v754_v7 = vpop.permute.xlu1 %753 }
0x134a   :  { %1849 = vmatmul.mubr.msk.bf16.vlgmr.msra.gmra.mrb[16].mxu1 %vm187_vm2, %v754_v7 }
0x134b   :  { %1865 = vmatpush3.bf16.msra.mxu1 %v2338_v50  ;;  %1868 = vmatprep.mubr.msk.bf16.mxu1 %vm2083_vm0, %v2082_v0 }
0x134c   :  { %1866 = vmatprep.subr.bf16.mxu1 %v2082_v0 }
0x134f   :  { %1867 = vmatpush3.bf16.msra.mxu1 %v2346_v6 }
0x1350   :  { %1872 = vmatprep.subr.bf16.mxu1 %v2082_v0 }
0x1352   :  { %1869 = vmatmul.mubr.bf16.vlgmr.msra.gmra.mrb[20].mxu1 %v2084_v10  ;;  %v163_v10 = vadd.f32 %v2235_v3, %v2186_v11 }
0x1353   :  { %1873 = vmatpush3.bf16.msra.mxu1 %v2338_v50  ;;  %1876 = vmatprep.mubr.msk.bf16.mxu1 %vm2083_vm0, %v2082_v0 }
0x1354   :  { %1874 = vmatprep.subr.bf16.mxu1 %v2082_v0 }
0x1357   :  { %1875 = vmatpush3.bf16.msra.mxu1 %v2346_v6 }
0x1358   :  { %1888 = vmatprep.subr.bf16.mxu1 %v2082_v0 }
0x13b6   :  { %v2364_v1 = vpop.f32.mrb[20].mxu0 }
0x13b7   :  { %v933_v8 = vpop.f32.mrb[21].mxu0 }
0x13b8   :  { %v2366_v13 = vpop.f32.mrb[22].mxu0  ;;  %v934_v23 = vadd.f32 %v2375_v22, %v933_v8 }
0x13b9   :  { %v2368_v14 = vpop.f32.mrb[23].mxu0 }
0x13ba   :  { %v937_v54 = vadd.f32 %v2375_v22, %v2368_v14 }
0x141d   :  { %v792_v16 = vpop.f32.mrb[16].mxu1 }
0x141e   :  { %v798_v17 = vadd.f32 %v792_v16, %v163_v10  ;;  %v1850_v19 = vpop.f32.mrb[17].mxu1 }
0x141f   :  { %v795_v20 = vpop.f32.mrb[18].mxu1 }
0x1420   :  { %v1851_v21 = vpop.f32.mrb[19].mxu1  ;;  %v1670_v38 = vmul.f32 -1.442695, %v798_v17 }
0x1425   :  { %v1019_v12 = vpop.f32.mrb[20].mxu1 }
0x1426   :  { %v1025_v24 = vadd.f32 %v1019_v12, %v934_v23  ;;  %v1870_v25 = vpop.f32.mrb[21].mxu1 }
0x1427   :  { %v1022_v2 = vpop.f32.mrb[22].mxu1 }
0x1428   :  { %2010 = vtanh.f32 %v1025_v24  ;;  %v1871_v26 = vpop.f32.mrb[23].mxu1  ;;  %v1685_v11 = vmul.f32 -1.442695, %v1025_v24 }
0x142a   :  { %2012 = vpow2.f32 %v1685_v11 }
0x1432   :  { %v2011_v27 = vpop.eup %2010 }
0x1433   :  { %1035 = vrot.lane.b32.xlu0 %v2011_v27, %s2085_s23 }
0x1434   :  { %v2013_v3 = vpop.eup %2012 }
0x1435   :  { %v1029_v9 = vadd.f32 1.0, %v2013_v3  ;;  %v942_v3 = vadd.f32 %v2364_v1, %v2375_v22 }
0x1437   :  { %2014 = vrcp.f32 %v1029_v9 }
0x1441   :  { %v2015_v28 = vpop.eup %2014 }
0x1442   :  { %v1033_v31 = vmul.f32 0.0, %v2015_v28 }
0x14a5   :  { %v1036_v30 = vpop.permute.xlu0 %1035 }
0x14a6   :  { %v1038_v4 = vmul.f32 %v2015_v28, %v1036_v30 }
0x14a8   :  { %1040 = vrot.lane.b32.xlu1 %v1038_v4, %s2086_s3 }
0x151a   :  { %v1041_v32 = vpop.permute.xlu1 %1040 }
0x151b   :  { %v1043_v33 = vadd.f32 %v1041_v32, %v1033_v31 }
0x151d   :  { %2016 = vtanh.f32 %v1043_v33 }
0x151e   :  { %2018 = vtanh.f32 %v798_v17 }
0x151f   :  { %2020 = vpow2.f32 %v1670_v38 }
0x1527   :  { %v2017_v34 = vpop.eup %2016 }
0x1528   :  { %1046 = vrot.lane.b32.xlu0 %v2017_v34, %s2085_s23  ;;  %v2019_v36 = vpop.eup %2018 }
0x1529   :  { %v2021_v39 = vpop.eup %2020 }
0x152a   :  { %v802_v40 = vadd.f32 1.0, %v2021_v39 }
0x152c   :  { %808 = vrot.lane.b32.xlu0 %v2019_v36, %s2085_s23  ;;  %2022 = vrcp.f32 %v802_v40 }
0x1536   :  { %v2023_v44 = vpop.eup %2022 }
0x1537   :  { %v806_v47 = vmul.f32 %v2023_v44, %v2311_v53 }
0x159a   :  { %v1047_v41 = vpop.permute.xlu0 %1046 }
0x159b   :  { %v1049_v42 = vmul.f32 %v2015_v28, %v1047_v41 }
0x159d   :  { %v1051_v43 = vpack.c.bf16 %v1049_v42, %v1049_v42 }
0x159e   :  { %v809_v15 = vpop.permute.xlu0 %808 }
0x159f   :  { %v811_v45 = vmul.f32 %v2023_v44, %v809_v15  ;;  %1053 = vrot.lane.b32.xlu1 %v1051_v43, %s2086_s3 }
0x15a1   :  { %813 = vrot.lane.b32.xlu0 %v811_v45, %s2086_s3 }
0x1611   :  { %v1054_v46 = vpop.permute.xlu1 %1053 }
0x1612   :  { %1877 = vmatmul.mubr.msk.bf16.vlgmr.msra.gmra.mrb[24].mxu1 %vm187_vm2, %v1054_v46 }
0x1613   :  { %v814_v48 = vpop.permute.xlu0 %813  ;;  %1889 = vmatpush3.bf16.msra.mxu1 %v2338_v50  ;;  %1892 = vmatprep.mubr.msk.bf16.mxu1 %vm2083_vm0, %v2082_v0 }
0x1614   :  { %v816_v49 = vadd.f32 %v814_v48, %v806_v47  ;;  %1890 = vmatprep.subr.bf16.mxu1 %v2082_v0  ;;  %v945_v47 = vadd.f32 %v2366_v13, %v2375_v22 }
0x1616   :  { %2024 = vtanh.f32 %v816_v49 }
0x1617   :  { %1891 = vmatpush3.bf16.msra.mxu1 %v2346_v6 }
0x1618   :  { %1904 = vmatprep.subr.bf16.mxu1 %v2082_v0 }
0x1620   :  { %v2025_v51 = vpop.eup %2024 }
0x1621   :  { %819 = vrot.lane.b32.xlu0 %v2025_v51, %s2085_s23 }
0x1625   :  { %584 = vrot.lane.b32.xlu0 %v2282_v18, %s2086_s3 }
0x1629   :  { %746 = vrot.lane.b32.xlu0 %v2328_v59, %s2086_s3 }
0x1693   :  { %v820_v63 = vpop.permute.xlu0 %819 }
0x1694   :  { %v822_v16 = vmul.f32 %v2023_v44, %v820_v63 }
0x1696   :  { %v1715_v17 = vpack.c.bf16 %v822_v16, %v822_v16 }
0x1697   :  { %v585_v52 = vpop.permute.xlu0 %584 }
0x1698   :  { %588 = vst.msk [vmem:[#allocation3 + $0x10] sm:$0xf] %vm263_vm3, %v585_v52 }
0x169b   :  { %v747_v53 = vpop.permute.xlu0 %746 }
0x169c   :  { %750 = vst.msk [vmem:[#allocation3 + $0x18] sm:$0xf] %vm263_vm3, %v747_v53 }
0x16e5   :  { %v1092_v55 = vpop.f32.mrb[24].mxu1 }
0x16e6   :  { %v1098_v56 = vadd.f32 %v1092_v55, %v937_v54  ;;  %v1878_v35 = vpop.f32.mrb[25].mxu1 }
0x16e7   :  { %v1095_v29 = vpop.f32.mrb[26].mxu1 }
0x16e8   :  { %2026 = vtanh.f32 %v1098_v56  ;;  %v1879_v57 = vpop.f32.mrb[27].mxu1  ;;  %v1687_v58 = vmul.f32 -1.442695, %v1098_v56 }
0x16ea   :  { %2028 = vpow2.f32 %v1687_v58 }
0x16f2   :  { %v2027_v18 = vpop.eup %2026 }
0x16f3   :  { %1108 = vrot.lane.b32.xlu1 %v2027_v18, %s2085_s23 }
0x16f4   :  { %v2029_v59 = vpop.eup %2028 }
0x16f5   :  { %v1102_v60 = vadd.f32 1.0, %v2029_v59 }
0x16f7   :  { %2030 = vrcp.f32 %v1102_v60 }
0x1701   :  { %v2031_v61 = vpop.eup %2030 }
0x1702   :  { %v1106_v7 = vmul.f32 %v2031_v61, %v1043_v33 }
0x1765   :  { %v1109_v5 = vpop.permute.xlu1 %1108 }
0x1766   :  { %v1111_v62 = vmul.f32 %v2031_v61, %v1109_v5 }
0x1768   :  { %1113 = vrot.lane.b32.xlu1 %v1111_v62, %s2086_s3 }
0x17da   :  { %v1114_v8 = vpop.permute.xlu1 %1113 }
0x17db   :  { %v1116_v14 = vadd.f32 %v1114_v8, %v1106_v7 }
0x17dd   :  { %2032 = vtanh.f32 %v1116_v14 }
0x17e7   :  { %v2033_v10 = vpop.eup %2032 }
0x17e8   :  { %1119 = vrot.lane.b32.xlu1 %v2033_v10, %s2085_s23 }
0x17ec   :  { %665 = vrot.lane.b32.xlu1 %v2298_v37, %s2086_s3 }
0x17f0   :  { %827 = vrot.lane.b32.xlu1 %v1715_v17, %s2086_s3 }
0x185a   :  { %v1120_v19 = vpop.permute.xlu1 %1119 }
0x185b   :  { %v1122_v20 = vmul.f32 %v2031_v61, %v1120_v19 }
0x185d   :  { %v1124_v21 = vpack.c.bf16 %v1122_v20, %v1122_v20 }
0x185e   :  { %v666_v23 = vpop.permute.xlu1 %665 }
0x185f   :  { %669 = vst.msk [vmem:[#allocation3 + $0x14] sm:$0xf] %vm263_vm3, %v666_v23  ;;  %1126 = vrot.lane.b32.xlu0 %v1124_v21, %s2086_s3 }
0x1862   :  { %v828_v12 = vpop.permute.xlu1 %827 }
0x1863   :  { %831 = vst.msk [vmem:[#allocation3 + $0x1c] sm:$0xf] %vm263_vm3, %v828_v12 }
0x1866   :  { %v1950_v24 = vld [vmem:[#allocation3 + $0x10] sm:$0xff]  }
0x1867   :  { %1860 = vmatprep.mubr.msk.bf16.mxu0 %vm187_vm2, %v1950_v24 }
0x186a   :  { %v1951_v25 = vld [vmem:[#allocation3 + $0x18] sm:$0xff]  }
0x186b   :  { %1861 = vmatmul.mubr.msk.bf16.gmra.mrb[24].mxu0 %vm187_vm2, %v1951_v25 }
0x186c   :  { %1884 = vmatprep.mubr.msk.bf16.mxu0 %vm2083_vm0, %v2082_v0 }
0x18d1   :  { %v1127_v37 = vpop.permute.xlu0 %1126 }
0x18d2   :  { %1885 = vmatmul.mubr.msk.bf16.vlgmr.msra.gmra.mrb[28].mxu0 %vm187_vm2, %v1127_v37 }
0x18d3   :  { %1897 = vmatpush3.bf16.msra.mxu0 %v2338_v50  ;;  %1900 = vmatprep.mubr.msk.bf16.mxu0 %vm2083_vm0, %v2082_v0 }
0x18d4   :  { %1898 = vmatprep.subr.bf16.mxu0 %v2082_v0 }
0x18d7   :  { %1899 = vmatpush3.bf16.msra.mxu0 %v2346_v6 }
0x18d8   :  { %1912 = vmatprep.subr.bf16.mxu0 %v2082_v0 }
0x193e   :  { %v2421_v2 = vpop.f32.mrb[24].mxu0 }
0x193f   :  { %v2423_v26 = vpop.f32.mrb[25].mxu0 }
0x1940   :  { %v2425_v27 = vpop.f32.mrb[26].mxu0  ;;  %v950_v7 = vadd.f32 %v2375_v22, %v2423_v26 }
0x1941   :  { %v2427_v11 = vpop.f32.mrb[27].mxu0 }
0x19a5   :  { %v1165_v9 = vpop.f32.mrb[28].mxu0 }
0x19a6   :  { %v1171_v28 = vadd.f32 %v1165_v9, %v942_v3  ;;  %v1886_v30 = vpop.f32.mrb[29].mxu0 }
0x19a7   :  { %v1168_v4 = vpop.f32.mrb[30].mxu0 }
0x19a8   :  { %2034 = vtanh.f32 %v1171_v28  ;;  %v1887_v31 = vpop.f32.mrb[31].mxu0  ;;  %v1689_v33 = vmul.f32 -1.442695, %v1171_v28 }
0x19aa   :  { %2036 = vpow2.f32 %v1689_v33 }
0x19b2   :  { %v2035_v32 = vpop.eup %2034 }
0x19b3   :  { %1181 = vrot.lane.b32.xlu1 %v2035_v32, %s2085_s23  ;;  %v953_v32 = vadd.f32 %v2375_v22, %v2427_v11 }
0x19b4   :  { %v2037_v34 = vpop.eup %2036 }
0x19b5   :  { %v1175_v36 = vadd.f32 1.0, %v2037_v34 }
0x19b7   :  { %2038 = vrcp.f32 %v1175_v36 }
0x19c1   :  { %v2039_v38 = vpop.eup %2038 }
0x19c2   :  { %v1179_v1 = vmul.f32 %v2039_v38, %v1116_v14 }
0x1a25   :  { %v1182_v39 = vpop.permute.xlu1 %1181 }
0x1a26   :  { %v1184_v40 = vmul.f32 %v2039_v38, %v1182_v39 }
0x1a28   :  { %1186 = vrot.lane.b32.xlu0 %v1184_v40, %s2086_s3 }
0x1a9a   :  { %v1187_v41 = vpop.permute.xlu0 %1186 }
0x1a9b   :  { %v1189_v42 = vadd.f32 %v1187_v41, %v1179_v1 }
0x1a9d   :  { %2040 = vtanh.f32 %v1189_v42 }
0x1aa7   :  { %v2041_v43 = vpop.eup %2040 }
0x1aa8   :  { %1192 = vrot.lane.b32.xlu1 %v2041_v43, %s2085_s23 }
0x1b1a   :  { %v1193_v44 = vpop.permute.xlu1 %1192 }
0x1b1b   :  { %v1195_v15 = vmul.f32 %v2039_v38, %v1193_v44 }
0x1b1d   :  { %v1197_v45 = vpack.c.bf16 %v1195_v15, %v1195_v15 }
0x1b1f   :  { %1199 = vrot.lane.b32.xlu0 %v1197_v45, %s2086_s3 }
0x1b91   :  { %v1200_v46 = vpop.permute.xlu0 %1199 }
0x1b92   :  { %1893 = vmatmul.mubr.msk.bf16.vlgmr.msra.gmra.mrb[28].mxu1 %vm187_vm2, %v1200_v46 }
0x1b93   :  { %1905 = vmatpush3.bf16.msra.mxu1 %v2338_v50  ;;  %1908 = vmatprep.mubr.msk.bf16.mxu1 %vm2083_vm0, %v2082_v0 }
0x1b94   :  { %1906 = vmatprep.subr.bf16.mxu1 %v2082_v0 }
0x1b97   :  { %1907 = vmatpush3.bf16.msra.mxu1 %v2346_v6 }
0x1b98   :  { %1920 = vmatprep.subr.bf16.mxu1 %v2082_v0 }
0x1c65   :  { %v1238_v48 = vpop.f32.mrb[28].mxu1 }
0x1c66   :  { %v1244_v49 = vadd.f32 %v1238_v48, %v945_v47  ;;  %v1894_v51 = vpop.f32.mrb[29].mxu1 }
0x1c67   :  { %v1241_v63 = vpop.f32.mrb[30].mxu1  ;;  %v958_v51 = vadd.f32 %v2421_v2, %v2375_v22 }
0x1c68   :  { %2042 = vtanh.f32 %v1244_v49  ;;  %v1895_v52 = vpop.f32.mrb[31].mxu1  ;;  %v1691_v54 = vmul.f32 -1.442695, %v1244_v49 }
0x1c6a   :  { %2044 = vpow2.f32 %v1691_v54 }
0x1c72   :  { %v2043_v53 = vpop.eup %2042 }
0x1c73   :  { %1254 = vrot.lane.b32.xlu1 %v2043_v53, %s2085_s23 }
0x1c74   :  { %v2045_v55 = vpop.eup %2044 }
0x1c75   :  { %v1248_v56 = vadd.f32 1.0, %v2045_v55 }
0x1c77   :  { %2046 = vrcp.f32 %v1248_v56 }
0x1c81   :  { %v2047_v35 = vpop.eup %2046 }
0x1c82   :  { %v1252_v13 = vmul.f32 %v2047_v35, %v1189_v42 }
0x1ce5   :  { %v1255_v29 = vpop.permute.xlu1 %1254 }
0x1ce6   :  { %v1257_v57 = vmul.f32 %v2047_v35, %v1255_v29 }
0x1ce8   :  { %1259 = vrot.lane.b32.xlu0 %v1257_v57, %s2086_s3 }
0x1d5a   :  { %v1260_v18 = vpop.permute.xlu0 %1259 }
0x1d5b   :  { %v1262_v58 = vadd.f32 %v1260_v18, %v1252_v13 }
0x1d5d   :  { %2048 = vtanh.f32 %v1262_v58 }
0x1d67   :  { %v2049_v59 = vpop.eup %2048 }
0x1d68   :  { %1265 = vrot.lane.b32.xlu1 %v2049_v59, %s2085_s23 }
0x1dda   :  { %v1266_v60 = vpop.permute.xlu1 %1265 }
0x1ddb   :  { %v1268_v61 = vmul.f32 %v2047_v35, %v1266_v60 }
0x1ddd   :  { %v1270_v5 = vpack.c.bf16 %v1268_v61, %v1268_v61 }
0x1ddf   :  { %1272 = vrot.lane.b32.xlu0 %v1270_v5, %s2086_s3 }
0x1e51   :  { %v1273_v62 = vpop.permute.xlu0 %1272 }
0x1e52   :  { %1901 = vmatmul.mubr.msk.bf16.vlgmr.msra.gmra.mrb[32].mxu0 %vm187_vm2, %v1273_v62 }
0x1e53   :  { %1913 = vmatpush3.bf16.msra.mxu0 %v2338_v50  ;;  %1916 = vmatprep.mubr.msk.bf16.mxu0 %vm2083_vm0, %v2082_v0 }
0x1e54   :  { %1914 = vmatprep.subr.bf16.mxu0 %v2082_v0 }
0x1e57   :  { %1915 = vmatpush3.bf16.msra.mxu0 %v2346_v6 }
0x1e58   :  { %1928 = vmatprep.subr.bf16.mxu0 %v2082_v0 }
0x1f25   :  { %v1311_v8 = vpop.f32.mrb[32].mxu0 }
0x1f26   :  { %v1317_v14 = vadd.f32 %v1311_v8, %v950_v7  ;;  %v1902_v10 = vpop.f32.mrb[33].mxu0 }
0x1f27   :  { %v1314_v16 = vpop.f32.mrb[34].mxu0 }
0x1f28   :  { %2050 = vtanh.f32 %v1317_v14  ;;  %v1903_v17 = vpop.f32.mrb[35].mxu0  ;;  %v1693_v20 = vmul.f32 -1.442695, %v1317_v14  ;;  %v961_v14 = vadd.f32 %v2425_v27, %v2375_v22 }
0x1f2a   :  { %2052 = vpow2.f32 %v1693_v20 }
0x1f32   :  { %v2051_v19 = vpop.eup %2050 }
0x1f33   :  { %1327 = vrot.lane.b32.xlu1 %v2051_v19, %s2085_s23 }
0x1f34   :  { %v2053_v21 = vpop.eup %2052 }
0x1f35   :  { %v1321_v23 = vadd.f32 1.0, %v2053_v21 }
0x1f37   :  { %2054 = vrcp.f32 %v1321_v23 }
0x1f41   :  { %v2055_v12 = vpop.eup %2054 }
0x1f42   :  { %v1325_v37 = vmul.f32 %v2055_v12, %v1262_v58 }
0x1fa5   :  { %v1328_v24 = vpop.permute.xlu1 %1327 }
0x1fa6   :  { %v1330_v25 = vmul.f32 %v2055_v12, %v1328_v24 }
0x1fa8   :  { %1332 = vrot.lane.b32.xlu0 %v1330_v25, %s2086_s3 }
0x201a   :  { %v1333_v26 = vpop.permute.xlu0 %1332 }
0x201b   :  { %v1335_v3 = vadd.f32 %v1333_v26, %v1325_v37 }
0x201d   :  { %2056 = vtanh.f32 %v1335_v3 }
0x2027   :  { %v2057_v9 = vpop.eup %2056 }
0x2028   :  { %1338 = vrot.lane.b32.xlu1 %v2057_v9, %s2085_s23  ;;  %v1952_v9 = vld [vmem:[%s2510_s7] sm:$0xff]  }
0x209a   :  { %v1339_v28 = vpop.permute.xlu1 %1338 }
0x209b   :  { %v1341_v30 = vmul.f32 %v2055_v12, %v1339_v28  ;;  %v1953_v28 = vld [vmem:[%s2510_s7 + $0x8] sm:$0xff]  }
0x209d   :  { %v1343_v4 = vpack.c.bf16 %v1341_v30, %v1341_v30 }
0x209f   :  { %1345 = vrot.lane.b32.xlu0 %v1343_v4, %s2086_s3 }
0x2111   :  { %v1346_v31 = vpop.permute.xlu0 %1345 }
0x2112   :  { %1909 = vmatmul.mubr.msk.bf16.vlgmr.msra.gmra.mrb[32].mxu1 %vm187_vm2, %v1346_v31 }
0x2113   :  { %1921 = vmatpush3.bf16.msra.mxu1 %v2338_v50  ;;  %1924 = vmatprep.mubr.msk.bf16.mxu1 %vm2083_vm0, %v2082_v0 }
0x2114   :  { %1922 = vmatprep.subr.bf16.mxu1 %v2082_v0 }
0x2117   :  { %1923 = vmatpush3.bf16.msra.mxu1 %v2346_v6 }
0x21e5   :  { %v1384_v33 = vpop.f32.mrb[32].mxu1 }
0x21e6   :  { %v1390_v34 = vadd.f32 %v1384_v33, %v953_v32  ;;  %v1910_v36 = vpop.f32.mrb[33].mxu1 }
0x21e7   :  { %v1387_v38 = vpop.f32.mrb[34].mxu1 }
0x21e8   :  { %2058 = vtanh.f32 %v1390_v34  ;;  %v1911_v39 = vpop.f32.mrb[35].mxu1  ;;  %v1695_v50 = vmul.f32 -1.442695, %v1390_v34  ;;  %v1700_v34 = vld [vmem:[%s2511_s8] ss:$0 sm:$0xff] }
0x21ea   :  { %2060 = vpow2.f32 %v1695_v50 }
0x21f2   :  { %v2059_v40 = vpop.eup %2058 }
0x21f3   :  { %1400 = vrot.lane.b32.xlu1 %v2059_v40, %s2085_s23 }
0x21f4   :  { %v2061_v1 = vpop.eup %2060 }
0x21f5   :  { %v1394_v41 = vadd.f32 1.0, %v2061_v1 }
0x21f7   :  { %2062 = vrcp.f32 %v1394_v41 }
0x2201   :  { %v2063_v42 = vpop.eup %2062 }
0x2202   :  { %v1398_v11 = vmul.f32 %v2063_v42, %v1335_v3 }
0x2265   :  { %v1401_v43 = vpop.permute.xlu1 %1400 }
0x2266   :  { %v1403_v6 = vmul.f32 %v2063_v42, %v1401_v43 }
0x2268   :  { %1405 = vrot.lane.b32.xlu0 %v1403_v6, %s2086_s3 }
0x22da   :  { %v1406_v44 = vpop.permute.xlu0 %1405 }
0x22db   :  { %v1408_v15 = vadd.f32 %v1406_v44, %v1398_v11 }
0x22dd   :  { %2064 = vtanh.f32 %v1408_v15 }
0x22e7   :  { %v2065_v45 = vpop.eup %2064 }
0x22e8   :  { %1411 = vrot.lane.b32.xlu1 %v2065_v45, %s2085_s23 }
0x235a   :  { %v1412_v46 = vpop.permute.xlu1 %1411 }
0x235b   :  { %v1414_v47 = vmul.f32 %v2063_v42, %v1412_v46 }
0x235d   :  { %v1416_v48 = vpack.c.bf16 %v1414_v47, %v1414_v47 }
0x235f   :  { %1418 = vrot.lane.b32.xlu0 %v1416_v48, %s2086_s3 }
0x23d1   :  { %v1419_v49 = vpop.permute.xlu0 %1418 }
0x23d2   :  { %1917 = vmatmul.mubr.msk.bf16.vlgmr.msra.gmra.mrb[36].mxu0 %vm187_vm2, %v1419_v49 }
0x23d3   :  { %1932 = vmatprep.mubr.msk.bf16.mxu0 %vm2083_vm0, %v2082_v0  ;;  %1929 = vmatpush3.bf16.msra.mxu0 %v1952_v9 }
0x23d4   :  { %1930 = vmatprep.subr.bf16.mxu0 %v2082_v0 }
0x23d7   :  { %1931 = vmatpush3.bf16.msra.mxu0 %v1953_v28 }
0x24a5   :  { %v1457_v63 = vpop.f32.mrb[36].mxu0 }
0x24a6   :  { %v1463_v52 = vadd.f32 %v1457_v63, %v958_v51  ;;  %v1918_v53 = vpop.f32.mrb[37].mxu0 }
0x24a7   :  { %v1460_v54 = vpop.f32.mrb[38].mxu0 }
0x24a8   :  { %2066 = vtanh.f32 %v1463_v52  ;;  %v1919_v55 = vpop.f32.mrb[39].mxu0  ;;  %v1697_v35 = vmul.f32 -1.442695, %v1463_v52 }
0x24aa   :  { %2068 = vpow2.f32 %v1697_v35 }
0x24b2   :  { %v2067_v56 = vpop.eup %2066 }
0x24b3   :  { %1473 = vrot.lane.b32.xlu1 %v2067_v56, %s2085_s23 }
0x24b4   :  { %v2069_v29 = vpop.eup %2068 }
0x24b5   :  { %v1467_v57 = vadd.f32 1.0, %v2069_v29 }
0x24b7   :  { %2070 = vrcp.f32 %v1467_v57 }
0x24c1   :  { %v2071_v13 = vpop.eup %2070 }
0x24c2   :  { %v1471_v2 = vmul.f32 %v2071_v13, %v1408_v15 }
0x2525   :  { %v1474_v18 = vpop.permute.xlu1 %1473 }
0x2526   :  { %v1476_v58 = vmul.f32 %v2071_v13, %v1474_v18 }
0x2528   :  { %1478 = vrot.lane.b32.xlu0 %v1476_v58, %s2086_s3 }
0x259a   :  { %v1479_v59 = vpop.permute.xlu0 %1478 }
0x259b   :  { %v1481_v60 = vadd.f32 %v1479_v59, %v1471_v2 }
0x259d   :  { %2072 = vtanh.f32 %v1481_v60 }
0x25a7   :  { %v2073_v61 = vpop.eup %2072 }
0x25a8   :  { %1484 = vrot.lane.b32.xlu1 %v2073_v61, %s2085_s23 }
0x261a   :  { %v1485_v5 = vpop.permute.xlu1 %1484 }
0x261b   :  { %v1487_v62 = vmul.f32 %v2071_v13, %v1485_v5 }
0x261d   :  { %v1489_v7 = vpack.c.bf16 %v1487_v62, %v1487_v62 }
0x261f   :  { %1491 = vrot.lane.b32.xlu0 %v1489_v7, %s2086_s3 }
0x2691   :  { %v1492_v8 = vpop.permute.xlu0 %1491 }
0x2692   :  { %1925 = vmatmul.mubr.msk.bf16.vlgmr.msra.gmra.mrb[36].mxu1 %vm187_vm2, %v1492_v8 }
0x2765   :  { %v1530_v10 = vpop.f32.mrb[36].mxu1 }
0x2766   :  { %v1536_v16 = vadd.f32 %v1530_v10, %v961_v14  ;;  %v1926_v17 = vpop.f32.mrb[37].mxu1 }
0x2767   :  { %v1533_v19 = vpop.f32.mrb[38].mxu1 }
0x2768   :  { %2074 = vtanh.f32 %v1536_v16  ;;  %v1927_v20 = vpop.f32.mrb[39].mxu1  ;;  %v1699_v23 = vmul.f32 -1.442695, %v1536_v16 }
0x276a   :  { %2076 = vpow2.f32 %v1699_v23 }
0x2772   :  { %v2075_v21 = vpop.eup %2074 }
0x2773   :  { %1546 = vrot.lane.b32.xlu1 %v2075_v21, %s2085_s23 }
0x2774   :  { %v2077_v12 = vpop.eup %2076 }
0x2775   :  { %v1540_v24 = vadd.f32 1.0, %v2077_v12 }
0x2777   :  { %2078 = vrcp.f32 %v1540_v24 }
0x2781   :  { %v2079_v25 = vpop.eup %2078 }
0x2782   :  { %v1544_v22 = vmul.f32 %v2079_v25, %v1481_v60 }
0x27e5   :  { %v1547_v37 = vpop.permute.xlu1 %1546 }
0x27e6   :  { %v1549_v26 = vmul.f32 %v2079_v25, %v1547_v37 }
0x27e8   :  { %1551 = vrot.lane.b32.xlu0 %v1549_v26, %s2086_s3 }
0x285a   :  { %v1552_v27 = vpop.permute.xlu0 %1551 }
0x285b   :  { %v1554_v3 = vadd.f32 %v1552_v27, %v1544_v22 }
0x285d   :  { %2080 = vtanh.f32 %v1554_v3 }
0x2867   :  { %v2081_v30 = vpop.eup %2080 }
0x2868   :  { %1557 = vrot.lane.b32.xlu1 %v2081_v30, %s2085_s23 }
0x28da   :  { %v1558_v4 = vpop.permute.xlu1 %1557 }
0x28db   :  { %v1560_v31 = vmul.f32 %v2079_v25, %v1558_v4 }
0x28dd   :  { %v1561_v32 = vpack.c.bf16 %v1560_v31, %v1560_v31 }
0x28df   :  { %1574 = vrot.lane.b32.xlu0 %v1561_v32, %s2086_s3 }
0x2951   :  { %v1575_v33 = vpop.permute.xlu0 %1574 }
0x2952   :  { %1933 = vmatmul.mubr.msk.bf16.vlgmr.msra.gmra.mrb[40].mxu0 %vm187_vm2, %v1575_v33 }
0x2a25   :  { %v1625_v36 = vpop.f32.mrb[40].mxu0 }
0x2a26   :  { %v1626_v38 = vadd.f32 %v1700_v34, %v1625_v36  ;;  %v1934_v0 = vpop.f32.mrb[41].mxu0 }
0x2a27   :  { %v1628_v39 = vpop.f32.mrb[42].mxu0 }
0x2a28   :  { %1632 = vst.msk [vmem:[%s2512_s9] sm:$0xff] %vm1631_vm4, %v1626_v38  ;;  %v1935_v40 = vpop.f32.mrb[43].mxu0 }

</bundles_post_ra>
